<compile_context>
chip_gen: v7x
topology: tpu7x:2x2x1
jax: 0.10.0
libtpu: 0.0.40
codegen_flags: <defaults>
</compile_context>

<pallas_src>
import math

import jax
import jax.numpy as jnp
from jax.experimental import pallas as pl
from jax.experimental.pallas import tpu as pltpu
from jax.scipy.linalg import block_diag

EPS = 1e-5


# --------------------------------- the kernel ---------------------------------


def _causal_gcn_kernel(
    x_ref, row_c_ref, row_r_ref, col_c_ref, col_r_ref, batch_r_ref, deg1_ref,
    feat_bn_ref, feat_w_ref, layer_vec_ref, layer_w_ref,
    att_w_ref, att_b_ref,
    branch_bn_ref, branch_w_ref, branch_b_ref, mix_ref,
    ro_bn1_ref, ro_w1_ref, ro_b1_ref, ro_bn2_ref, ro_w2_ref, ro_b2_ref,
    xc_out_ref, xo_out_ref, xco_out_ref,
):
    f32 = jnp.float32
    bf16 = jnp.bfloat16
    N = x_ref.shape[0]
    E = row_c_ref.shape[0]
    G = xc_out_ref.shape[0]
    H = feat_w_ref.shape[1]
    L = layer_vec_ref.shape[0] // 3
    H3 = ro_w1_ref.shape[0]  # = 3 * H

    def mm(a, b):
        return jnp.dot(a, b, preferred_element_type=f32)

    def bn(z, g, b):
        # BatchNorm1d, training mode: batch stats, biased variance.
        mean = jnp.mean(z, axis=0, keepdims=True)
        var = jnp.mean((z - mean) ** 2, axis=0, keepdims=True)
        return (z - mean) * jax.lax.rsqrt(var + EPS) * g + b

    def _col(z, j):  # column j of a narrow value as [R,1] (mask + lane reduce)
        ids = jax.lax.broadcasted_iota(jnp.int32, z.shape, 1)
        return jnp.sum(jnp.where(ids == j, z, 0.0), axis=1, keepdims=True)

    def _row(z, i):  # row i of a small slab as [1,C] (mask + sublane reduce)
        ids = jax.lax.broadcasted_iota(jnp.int32, z.shape, 0)
        return jnp.sum(jnp.where(ids == i, z, 0.0), axis=0, keepdims=True)

    def onehot(idx, shape, axis):
        iota = jax.lax.broadcasted_iota(jnp.int32, shape, axis)
        return jnp.where(idx == iota, 1.0, 0.0).astype(bf16)

    def sigmoid(z):  # exact 2-way softmax: softmax([a,b])[0] == sigmoid(a-b)
        return 1.0 / (1.0 + jnp.exp(-z))

    def log_softmax(v):
        m = jnp.max(v, axis=-1, keepdims=True)
        s = v - m
        return s - jnp.log(jnp.sum(jnp.exp(s), axis=-1, keepdims=True))

    # --- one-hot selectors, built in-registers from the int index vectors ----
    sel_row = onehot(row_c_ref[...], (E, N), 1)     # [E,N] one-hot(edge_index[0])
    sel_col = onehot(col_c_ref[...], (E, N), 1)     # [E,N] one-hot(edge_index[1])
    sel_rowT = onehot(row_r_ref[...], (N, E), 0)    # [N,E]
    sel_colT = onehot(col_r_ref[...], (N, E), 0)    # [N,E]
    pool = onehot(batch_r_ref[...], (G, N), 0)      # [G,N] one-hot(batch)

    deg1 = deg1_ref[...]                            # [N,1] unit degree + self loop
    dis1 = jnp.where(deg1 > 0.0, jax.lax.rsqrt(deg1), 0.0)

    def propagate(hw, dis, bias):
        # out = D^-1/2 S_col^T S_row D^-1/2 hw + D^-1 hw (self loop) + bias
        hws = dis * hw
        msg = mm(sel_row, hws.astype(bf16))         # gather at edge_index[0]
        agg = mm(sel_colT, msg.astype(bf16))        # scatter-add at edge_index[1]
        return dis * (agg + hws) + bias

    # --- bn_feat -> conv_feat (gfn=True: X@W only, no bias) -> ReLU -----------
    fb = feat_bn_ref[...]
    h = bn(x_ref[...], _row(fb, 0), _row(fb, 1))
    h = jnp.maximum(mm(h, feat_w_ref[...]), 0.0)    # [N,H]

    # --- GCN stack (unit edge weights) ----------------------------------------
    lv = layer_vec_ref[...]
    for i in range(L):
        g, b, cb = _row(lv, 3 * i), _row(lv, 3 * i + 1), _row(lv, 3 * i + 2)
        w = layer_w_ref[i * H:(i + 1) * H, :]
        h = jnp.maximum(propagate(mm(bn(h, g, b), w), dis1, cb), 0.0)

    # --- edge / node attention (reassociated; exact 2-way softmax) ------------
    heads = mm(h, att_w_ref[...])                   # [N,3]: e_row, e_col, node diffs
    eb = att_b_ref[...]                             # [1,2]: (e_bias_diff, n_bias_diff)
    d_row = _col(heads, 0) + _col(eb, 0)            # bias folded (one-hot rows sum to 1)
    d_col = _col(heads, 1)
    n_diff = _col(heads, 2) + _col(eb, 1)
    edge_diff = mm(sel_row, d_row.astype(bf16)) + mm(sel_col, d_col.astype(bf16))
    ew_c = sigmoid(edge_diff)                       # [E,1] == softmax(edge logits)[:,0]
    ew_o = 1.0 - ew_c
    na_c = sigmoid(n_diff)                          # [N,1]
    na_o = 1.0 - na_c

    # attention-weighted degrees (+1 self loop); deg_o from ew_c + ew_o == 1
    deg_c = mm(sel_rowT, ew_c.astype(bf16)) + 1.0   # [N,1]
    deg_o = deg1 + 1.0 - deg_c
    dis_c = jax.lax.rsqrt(deg_c)
    dis_o = jax.lax.rsqrt(deg_o)

    # --- lane-fused context|object branch: one BN, block-diag conv, one
    #     gather + one scatter over the selectors, 64-lane-wide intermediates --
    cat = jnp.concatenate([na_c * h, na_o * h], axis=-1)       # [N,2H] = [xc|xo]
    bb = branch_bn_ref[...]
    cat = bn(cat, _row(bb, 0), _row(bb, 1))
    xw = mm(cat, branch_w_ref[...])                  # block-diag(ctx_w, obj_w)
    lane_n = jax.lax.broadcasted_iota(jnp.int32, (N, 2 * H), 1)
    dis_cat = jnp.where(lane_n < H, dis_c, dis_o)
    z = dis_cat * xw
    msg = mm(sel_row, z.astype(bf16))                # [E,2H]
    lane_e = jax.lax.broadcasted_iota(jnp.int32, (E, 2 * H), 1)
    msg = jnp.where(lane_e < H, ew_c, ew_o) * msg
    agg = mm(sel_colT, msg.astype(bf16))             # [N,2H]
    branch = jnp.maximum(dis_cat * (agg + z) + branch_b_ref[...], 0.0)

    # --- global_add_pool + [xc_p | xo_p | xc_p + xo_p] via mix matrix ---------
    # TODO(synk): with_random shuffle of xc across graphs is stochastic in the
    # reference; modeled as the identity permutation (cat_or_add='add').
    pooled = mm(pool, branch.astype(bf16))           # [G,2H]
    ro_in = mm(pooled, mix_ref[...])                 # [G,3H]

    # --- fused readout heads (block-diag fc1, zero-padded per-head fc2) -------
    r1 = ro_bn1_ref[...]
    zz = bn(ro_in, _row(r1, 0), _row(r1, 1))
    zz = jnp.maximum(mm(zz, ro_w1_ref[...]) + ro_b1_ref[...], 0.0)
    r2 = ro_bn2_ref[...]
    zz = bn(zz, _row(r2, 0), _row(r2, 1))
    rb2 = ro_b2_ref[...]
    for t, out_ref in enumerate((xc_out_ref, xo_out_ref, xco_out_ref)):
        w2 = ro_w2_ref[t * H3:(t + 1) * H3, :]       # [3H,C], zero-padded per head
        out_ref[...] = log_softmax(mm(zz, w2) + _row(rb2, t))


# ----------------------------------- wrapper -----------------------------------


def causal_gcn_forward(params, x, edge_index, batch, num_graphs, num_layers):
    assert num_layers >= 1
    n = x.shape[0]
    H = params["conv_feat_w"].shape[1]
    C = params["fc2_c_w"].shape[1]
    f32 = lambda a: jnp.asarray(a, jnp.float32)

    row = edge_index[0].astype(jnp.int32)
    col = edge_index[1].astype(jnp.int32)
    e = row.shape[0]

    # Tiny O(E+N) index vectors; the dense one-hot selectors are built in-kernel.
    row_c, row_r = row[:, None], row[None, :]
    col_c, col_r = col[:, None], col[None, :]
    batch_r = batch.astype(jnp.int32)[None, :]
    deg1 = (jnp.zeros((n,), jnp.float32).at[row].add(1.0) + 1.0)[:, None]   # [N,1]

    # ----- parameter slabs (few DMA descriptors instead of ~45) -----
    feat_bn = jnp.stack([f32(params["bn_feat_g"]), f32(params["bn_feat_b"])])      # [2,F]
    feat_w = f32(params["conv_feat_w"])                                            # [F,H]
    layer_vec = jnp.stack(
        [f32(v) for i in range(num_layers)
         for v in (params["bns_g"][i], params["bns_b"][i], params["convs_b"][i])])  # [3L,H]
    layer_w = jnp.concatenate(
        [f32(params["convs_w"][i]) for i in range(num_layers)], axis=0)            # [L*H,H]

    ew = f32(params["edge_att_w"]); ebv = f32(params["edge_att_b"])
    nw = f32(params["node_att_w"]); nbv = f32(params["node_att_b"])
    att_w = jnp.stack(
        [ew[:H, 0] - ew[:H, 1], ew[H:, 0] - ew[H:, 1], nw[:, 0] - nw[:, 1]], axis=1)  # [H,3]
    att_b = jnp.stack([ebv[0] - ebv[1], nbv[0] - nbv[1]])[None, :]                  # [1,2]

    branch_bn = jnp.stack([
        jnp.concatenate([f32(params["bnc_g"]), f32(params["bno_g"])]),
        jnp.concatenate([f32(params["bnc_b"]), f32(params["bno_b"])])])             # [2,2H]
    branch_w = block_diag(f32(params["context_w"]), f32(params["objects_w"]))       # [2H,2H]
    branch_b = jnp.concatenate(
        [f32(params["context_b"]), f32(params["objects_b"])])[None, :]              # [1,2H]

    eye = jnp.eye(H, dtype=jnp.float32)
    zro = jnp.zeros((H, H), jnp.float32)
    mix = jnp.concatenate([jnp.concatenate([eye, zro, eye], axis=1),
                           jnp.concatenate([zro, eye, eye], axis=1)], axis=0)        # [2H,3H]

    tags = ("c", "o", "co")
    ro_bn1 = jnp.stack([jnp.concatenate([f32(params[f"fc1_bn_{t}_g"]) for t in tags]),
                        jnp.concatenate([f32(params[f"fc1_bn_{t}_b"]) for t in tags])])  # [2,3H]
    ro_w1 = block_diag(*[f32(params[f"fc1_{t}_w"]) for t in tags])                   # [3H,3H]
    ro_b1 = jnp.concatenate([f32(params[f"fc1_{t}_b"]) for t in tags])[None, :]      # [1,3H]
    ro_bn2 = jnp.stack([jnp.concatenate([f32(params[f"fc2_bn_{t}_g"]) for t in tags]),
                        jnp.concatenate([f32(params[f"fc2_bn_{t}_b"]) for t in tags])])  # [2,3H]
    ro_w2 = jnp.concatenate(
        [jnp.zeros((3 * H, C), jnp.float32).at[t * H:(t + 1) * H, :].set(
            f32(params[f"fc2_{tag}_w"])) for t, tag in enumerate(tags)], axis=0)     # [9H,C]
    ro_b2 = jnp.stack([f32(params[f"fc2_{t}_b"]) for t in tags])                     # [3,C]

    inputs = [
        x.astype(jnp.float32), row_c, row_r, col_c, col_r, batch_r, deg1,
        feat_bn, feat_w, layer_vec, layer_w, att_w, att_b,
        branch_bn, branch_w, branch_b, mix,
        ro_bn1, ro_w1, ro_b1, ro_bn2, ro_w2, ro_b2,
    ]

    # Explicit VMEM budget: inputs (double-buffered) + in-kernel selectors +
    # node/edge-wide temporaries, clamped to a generation-safe ceiling.
    in_bytes = sum(math.prod(a.shape) * jnp.dtype(a.dtype).itemsize for a in inputs)
    est = (2 * in_bytes
           + 6 * e * n * 2              # bf16 selectors built in-kernel
           + 12 * n * 2 * H * 4         # node-wide f32 temporaries
           + 8 * e * 2 * H * 4          # edge-wide f32 temporaries
           + (2 << 20))
    vmem_limit = int(min(max(est, 16 << 20), 48 << 20))

    out_sds = jax.ShapeDtypeStruct((num_graphs, C), jnp.float32)
    out_spec = pl.BlockSpec((num_graphs, C), lambda i: (0, 0))
    return pl.pallas_call(
        _causal_gcn_kernel,
        out_shape=(out_sds, out_sds, out_sds),
        grid=(1,),
        in_specs=[pl.BlockSpec(a.shape, lambda i: (0, 0)) for a in inputs],
        out_specs=(out_spec, out_spec, out_spec),
        compiler_params=pltpu.CompilerParams(
            dimension_semantics=("arbitrary",),
            vmem_limit_bytes=vmem_limit),
    )(*inputs)


# ------------------------------ parameter init ------------------------------


def init_params(key, num_features, hidden, num_classes, num_layers):
    def lin(key, fan_in, fan_out):
        kw, kb = jax.random.split(key)
        w = jax.random.normal(kw, (fan_in, fan_out), jnp.float32) / jnp.sqrt(fan_in)
        b = jax.random.normal(kb, (fan_out,), jnp.float32) * 0.01
        return w, b

    # BatchNorm1d init as in the module: weight=1, bias=1e-4
    bn = lambda d: (jnp.ones((d,), jnp.float32), jnp.full((d,), 1e-4, jnp.float32))

    keys = jax.random.split(key, 16)
    p = {}
    p["bn_feat_g"], p["bn_feat_b"] = bn(num_features)
    p["conv_feat_w"], _ = lin(keys[0], num_features, hidden)  # gfn: bias unused
    p["bns_g"], p["bns_b"], p["convs_w"], p["convs_b"] = [], [], [], []
    lkeys = jax.random.split(keys[1], num_layers)
    for i in range(num_layers):
        g, b = bn(hidden)
        p["bns_g"].append(g); p["bns_b"].append(b)
        w, bb = lin(lkeys[i], hidden, hidden)
        p["convs_w"].append(w); p["convs_b"].append(bb)
    p["edge_att_w"], p["edge_att_b"] = lin(keys[2], 2 * hidden, 2)
    p["node_att_w"], p["node_att_b"] = lin(keys[3], hidden, 2)
    p["bnc_g"], p["bnc_b"] = bn(hidden)
    p["bno_g"], p["bno_b"] = bn(hidden)
    p["context_w"], p["context_b"] = lin(keys[4], hidden, hidden)
    p["objects_w"], p["objects_b"] = lin(keys[5], hidden, hidden)
    k = 6
    for tag in ("c", "o", "co"):
        p[f"fc1_bn_{tag}_g"], p[f"fc1_bn_{tag}_b"] = bn(hidden)
        p[f"fc1_{tag}_w"], p[f"fc1_{tag}_b"] = lin(keys[k], hidden, hidden); k += 1
        p[f"fc2_bn_{tag}_g"], p[f"fc2_bn_{tag}_b"] = bn(hidden)
        p[f"fc2_{tag}_w"], p[f"fc2_{tag}_b"] = lin(keys[k], hidden, num_classes); k += 1
    return p


# ------------------------------------ main ------------------------------------

if __name__ == "__main__":
    # config (args)
    num_features = 4
    hidden = 32
    num_classes = 3
    num_layers = 2       # args.layers
    num_graphs = 2
    nodes_per_graph = 8
    n = num_graphs * nodes_per_graph  # 16 nodes

    key = jax.random.PRNGKey(0)
    kx, kp = jax.random.split(key)

    # deterministic example graph: two 8-node rings (bidirectional edges)
    rows, cols = [], []
    for g in range(num_graphs):
        base = g * nodes_per_graph
        for i in range(nodes_per_graph):
            j = (i + 1) % nodes_per_graph
            rows += [base + i, base + j]
            cols += [base + j, base + i]
    edge_index = jnp.array([rows, cols], dtype=jnp.int32)   # [2, 32]
    batch = jnp.repeat(jnp.arange(num_graphs, dtype=jnp.int32), nodes_per_graph)
    x = jax.random.normal(kx, (n, num_features), jnp.float32)  # [16, 4]

    params = init_params(kp, num_features, hidden, num_classes, num_layers)

    forward = jax.jit(causal_gcn_forward, static_argnums=(4, 5))
    xc_logis, xo_logis, xco_logis = forward(
        params, x, edge_index, batch, num_graphs, num_layers
    )
    jax.block_until_ready((xc_logis, xo_logis, xco_logis))

    assert xc_logis.shape == (num_graphs, num_classes)
    assert xo_logis.shape == (num_graphs, num_classes)
    assert xco_logis.shape == (num_graphs, num_classes)
    assert bool(jnp.all(jnp.isfinite(xc_logis)))
    assert bool(jnp.all(jnp.isfinite(xo_logis)))
    assert bool(jnp.all(jnp.isfinite(xco_logis)))
    print("KERNEL_OK")
</pallas_src>

<mosaic_0001>
module attributes {stable_mosaic.version = 11 : i64} {
  func.func private @main(%arg0: i32) attributes {dimension_semantics = [#tpu.dimension_semantics<core_parallel>], iteration_bounds = array<i64: 2>, tpu.core_type = #tpu.core_type<sc_scalar_subcore>, window_params = []} {
    return
  }
}

module attributes {stable_mosaic.version = 11 : i64} {
  func.func private @main(%arg0: i32) attributes {dimension_semantics = [#tpu.dimension_semantics<core_parallel>], iteration_bounds = array<i64: 2>, tpu.core_type = #tpu.core_type<sc_scalar_subcore>, window_params = []} {
    return
  }
}

module attributes {stable_mosaic.version = 11 : i64} {
  func.func @_causal_gcn_kernel(%arg0: i32, %arg1: memref<16x4xf32, #tpu.memory_space<vmem>>, %arg2: memref<32x1xi32, #tpu.memory_space<vmem>>, %arg3: memref<1x32xi32, #tpu.memory_space<vmem>>, %arg4: memref<32x1xi32, #tpu.memory_space<vmem>>, %arg5: memref<1x32xi32, #tpu.memory_space<vmem>>, %arg6: memref<1x16xi32, #tpu.memory_space<vmem>>, %arg7: memref<16x1xf32, #tpu.memory_space<vmem>>, %arg8: memref<2x4xf32, #tpu.memory_space<vmem>>, %arg9: memref<4x32xf32, #tpu.memory_space<vmem>>, %arg10: memref<6x32xf32, #tpu.memory_space<vmem>>, %arg11: memref<64x32xf32, #tpu.memory_space<vmem>>, %arg12: memref<32x3xf32, #tpu.memory_space<vmem>>, %arg13: memref<1x2xf32, #tpu.memory_space<vmem>>, %arg14: memref<2x64xf32, #tpu.memory_space<vmem>>, %arg15: memref<64x64xf32, #tpu.memory_space<vmem>>, %arg16: memref<1x64xf32, #tpu.memory_space<vmem>>, %arg17: memref<64x96xf32, #tpu.memory_space<vmem>>, %arg18: memref<2x96xf32, #tpu.memory_space<vmem>>, %arg19: memref<96x96xf32, #tpu.memory_space<vmem>>, %arg20: memref<1x96xf32, #tpu.memory_space<vmem>>, %arg21: memref<2x96xf32, #tpu.memory_space<vmem>>, %arg22: memref<288x3xf32, #tpu.memory_space<vmem>>, %arg23: memref<3x3xf32, #tpu.memory_space<vmem>>, %arg24: memref<2x3xf32, #tpu.memory_space<vmem>>, %arg25: memref<2x3xf32, #tpu.memory_space<vmem>>, %arg26: memref<2x3xf32, #tpu.memory_space<vmem>>) attributes {dimension_semantics = [#tpu.dimension_semantics<arbitrary>], iteration_bounds = array<i64: 1>, scalar_prefetch = 0 : i64, scratch_operands = 0 : i64, tpu.core_type = #tpu.core_type<tc>, window_params = [{pipeline_mode = #tpu.pipeline_mode<synchronous>, transform_indices = @transform_0, window_bounds = array<i64: 16, 4>}, {pipeline_mode = #tpu.pipeline_mode<synchronous>, transform_indices = @transform_1, window_bounds = array<i64: 32, 1>}, {pipeline_mode = #tpu.pipeline_mode<synchronous>, transform_indices = @transform_2, window_bounds = array<i64: 1, 32>}, {pipeline_mode = #tpu.pipeline_mode<synchronous>, transform_indices = @transform_3, window_bounds = array<i64: 32, 1>}, {pipeline_mode = #tpu.pipeline_mode<synchronous>, transform_indices = @transform_4, window_bounds = array<i64: 1, 32>}, {pipeline_mode = #tpu.pipeline_mode<synchronous>, transform_indices = @transform_5, window_bounds = array<i64: 1, 16>}, {pipeline_mode = #tpu.pipeline_mode<synchronous>, transform_indices = @transform_6, window_bounds = array<i64: 16, 1>}, {pipeline_mode = #tpu.pipeline_mode<synchronous>, transform_indices = @transform_7, window_bounds = array<i64: 2, 4>}, {pipeline_mode = #tpu.pipeline_mode<synchronous>, transform_indices = @transform_8, window_bounds = array<i64: 4, 32>}, {pipeline_mode = #tpu.pipeline_mode<synchronous>, transform_indices = @transform_9, window_bounds = array<i64: 6, 32>}, {pipeline_mode = #tpu.pipeline_mode<synchronous>, transform_indices = @transform_10, window_bounds = array<i64: 64, 32>}, {pipeline_mode = #tpu.pipeline_mode<synchronous>, transform_indices = @transform_11, window_bounds = array<i64: 32, 3>}, {pipeline_mode = #tpu.pipeline_mode<synchronous>, transform_indices = @transform_12, window_bounds = array<i64: 1, 2>}, {pipeline_mode = #tpu.pipeline_mode<synchronous>, transform_indices = @transform_13, window_bounds = array<i64: 2, 64>}, {pipeline_mode = #tpu.pipeline_mode<synchronous>, transform_indices = @transform_14, window_bounds = array<i64: 64, 64>}, {pipeline_mode = #tpu.pipeline_mode<synchronous>, transform_indices = @transform_15, window_bounds = array<i64: 1, 64>}, {pipeline_mode = #tpu.pipeline_mode<synchronous>, transform_indices = @transform_16, window_bounds = array<i64: 64, 96>}, {pipeline_mode = #tpu.pipeline_mode<synchronous>, transform_indices = @transform_17, window_bounds = array<i64: 2, 96>}, {pipeline_mode = #tpu.pipeline_mode<synchronous>, transform_indices = @transform_18, window_bounds = array<i64: 96, 96>}, {pipeline_mode = #tpu.pipeline_mode<synchronous>, transform_indices = @transform_19, window_bounds = array<i64: 1, 96>}, {pipeline_mode = #tpu.pipeline_mode<synchronous>, transform_indices = @transform_20, window_bounds = array<i64: 2, 96>}, {pipeline_mode = #tpu.pipeline_mode<synchronous>, transform_indices = @transform_21, window_bounds = array<i64: 288, 3>}, {pipeline_mode = #tpu.pipeline_mode<synchronous>, transform_indices = @transform_22, window_bounds = array<i64: 3, 3>}, {pipeline_mode = #tpu.pipeline_mode<synchronous>, transform_indices = @transform_23, window_bounds = array<i64: 2, 3>}, {pipeline_mode = #tpu.pipeline_mode<synchronous>, transform_indices = @transform_24, window_bounds = array<i64: 2, 3>}, {pipeline_mode = #tpu.pipeline_mode<synchronous>, transform_indices = @transform_25, window_bounds = array<i64: 2, 3>}]} {
    %c0 = arith.constant 0 : index
    %c0_0 = arith.constant 0 : index
    %0 = vector.load %arg2[%c0, %c0_0] : memref<32x1xi32, #tpu.memory_space<vmem>>, vector<32x1xi32>
    %1 = tpu.iota {dimensions = array<i32: 1>} : vector<32x16xi32>
    %2 = vector.broadcast %0 : vector<32x1xi32> to vector<32x16xi32>
    %3 = arith.cmpi eq, %2, %1 : vector<32x16xi32>
    %cst = arith.constant 1.000000e+00 : f32
    %cst_1 = arith.constant 0.000000e+00 : f32
    %4 = vector.broadcast %cst : f32 to vector<32x16xf32>
    %5 = vector.broadcast %cst_1 : f32 to vector<32x16xf32>
    %6 = arith.select %3, %4, %5 : vector<32x16xi1>, vector<32x16xf32>
    %7 = arith.truncf %6 : vector<32x16xf32> to vector<32x16xbf16>
    %c0_2 = arith.constant 0 : index
    %c0_3 = arith.constant 0 : index
    %8 = vector.load %arg4[%c0_2, %c0_3] : memref<32x1xi32, #tpu.memory_space<vmem>>, vector<32x1xi32>
    %9 = tpu.iota {dimensions = array<i32: 1>} : vector<32x16xi32>
    %10 = vector.broadcast %8 : vector<32x1xi32> to vector<32x16xi32>
    %11 = arith.cmpi eq, %10, %9 : vector<32x16xi32>
    %cst_4 = arith.constant 1.000000e+00 : f32
    %cst_5 = arith.constant 0.000000e+00 : f32
    %12 = vector.broadcast %cst_4 : f32 to vector<32x16xf32>
    %13 = vector.broadcast %cst_5 : f32 to vector<32x16xf32>
    %14 = arith.select %11, %12, %13 : vector<32x16xi1>, vector<32x16xf32>
    %15 = arith.truncf %14 : vector<32x16xf32> to vector<32x16xbf16>
    %c0_6 = arith.constant 0 : index
    %c0_7 = arith.constant 0 : index
    %16 = vector.load %arg3[%c0_6, %c0_7] : memref<1x32xi32, #tpu.memory_space<vmem>>, vector<1x32xi32>
    %17 = tpu.iota {dimensions = array<i32: 0>} : vector<16x32xi32>
    %18 = vector.broadcast %16 : vector<1x32xi32> to vector<16x32xi32>
    %19 = arith.cmpi eq, %18, %17 : vector<16x32xi32>
    %cst_8 = arith.constant 1.000000e+00 : f32
    %cst_9 = arith.constant 0.000000e+00 : f32
    %20 = vector.broadcast %cst_8 : f32 to vector<16x32xf32>
    %21 = vector.broadcast %cst_9 : f32 to vector<16x32xf32>
    %22 = arith.select %19, %20, %21 : vector<16x32xi1>, vector<16x32xf32>
    %23 = arith.truncf %22 : vector<16x32xf32> to vector<16x32xbf16>
    %c0_10 = arith.constant 0 : index
    %c0_11 = arith.constant 0 : index
    %24 = vector.load %arg5[%c0_10, %c0_11] : memref<1x32xi32, #tpu.memory_space<vmem>>, vector<1x32xi32>
    %25 = tpu.iota {dimensions = array<i32: 0>} : vector<16x32xi32>
    %26 = vector.broadcast %24 : vector<1x32xi32> to vector<16x32xi32>
    %27 = arith.cmpi eq, %26, %25 : vector<16x32xi32>
    %cst_12 = arith.constant 1.000000e+00 : f32
    %cst_13 = arith.constant 0.000000e+00 : f32
    %28 = vector.broadcast %cst_12 : f32 to vector<16x32xf32>
    %29 = vector.broadcast %cst_13 : f32 to vector<16x32xf32>
    %30 = arith.select %27, %28, %29 : vector<16x32xi1>, vector<16x32xf32>
    %31 = arith.truncf %30 : vector<16x32xf32> to vector<16x32xbf16>
    %c0_14 = arith.constant 0 : index
    %c0_15 = arith.constant 0 : index
    %32 = vector.load %arg6[%c0_14, %c0_15] : memref<1x16xi32, #tpu.memory_space<vmem>>, vector<1x16xi32>
    %33 = tpu.iota {dimensions = array<i32: 0>} : vector<2x16xi32>
    %34 = vector.broadcast %32 : vector<1x16xi32> to vector<2x16xi32>
    %35 = arith.cmpi eq, %34, %33 : vector<2x16xi32>
    %cst_16 = arith.constant 1.000000e+00 : f32
    %cst_17 = arith.constant 0.000000e+00 : f32
    %36 = vector.broadcast %cst_16 : f32 to vector<2x16xf32>
    %37 = vector.broadcast %cst_17 : f32 to vector<2x16xf32>
    %38 = arith.select %35, %36, %37 : vector<2x16xi1>, vector<2x16xf32>
    %39 = arith.truncf %38 : vector<2x16xf32> to vector<2x16xbf16>
    %c0_18 = arith.constant 0 : index
    %c0_19 = arith.constant 0 : index
    %40 = vector.load %arg7[%c0_18, %c0_19] : memref<16x1xf32, #tpu.memory_space<vmem>>, vector<16x1xf32>
    %cst_20 = arith.constant 0.000000e+00 : f32
    %41 = vector.broadcast %cst_20 : f32 to vector<16x1xf32>
    %42 = arith.cmpf ogt, %40, %41 : vector<16x1xf32>
    %43 = math.rsqrt %40 : vector<16x1xf32>
    %cst_21 = arith.constant 0.000000e+00 : f32
    %44 = vector.broadcast %cst_21 : f32 to vector<16x1xf32>
    %45 = arith.select %42, %43, %44 : vector<16x1xi1>, vector<16x1xf32>
    %c0_22 = arith.constant 0 : index
    %c0_23 = arith.constant 0 : index
    %46 = vector.load %arg8[%c0_22, %c0_23] : memref<2x4xf32, #tpu.memory_space<vmem>>, vector<2x4xf32>
    %c0_24 = arith.constant 0 : index
    %c0_25 = arith.constant 0 : index
    %47 = vector.load %arg1[%c0_24, %c0_25] : memref<16x4xf32, #tpu.memory_space<vmem>>, vector<16x4xf32>
    %48 = tpu.iota {dimensions = array<i32: 0>} : vector<2x4xi32>
    %c0_i32 = arith.constant 0 : i32
    %49 = vector.broadcast %c0_i32 : i32 to vector<2x4xi32>
    %50 = arith.cmpi eq, %48, %49 : vector<2x4xi32>
    %cst_26 = arith.constant 0.000000e+00 : f32
    %51 = vector.broadcast %cst_26 : f32 to vector<2x4xf32>
    %52 = arith.select %50, %46, %51 : vector<2x4xi1>, vector<2x4xf32>
    %cst_27 = arith.constant dense<0.000000e+00> : vector<4xf32>
    %53 = vector.multi_reduction <add>, %52, %cst_27 [0] : vector<2x4xf32> to vector<4xf32>
    %54 = vector.shape_cast %53 : vector<4xf32> to vector<1x4xf32>
    %55 = tpu.iota {dimensions = array<i32: 0>} : vector<2x4xi32>
    %c1_i32 = arith.constant 1 : i32
    %56 = vector.broadcast %c1_i32 : i32 to vector<2x4xi32>
    %57 = arith.cmpi eq, %55, %56 : vector<2x4xi32>
    %cst_28 = arith.constant 0.000000e+00 : f32
    %58 = vector.broadcast %cst_28 : f32 to vector<2x4xf32>
    %59 = arith.select %57, %46, %58 : vector<2x4xi1>, vector<2x4xf32>
    %cst_29 = arith.constant dense<0.000000e+00> : vector<4xf32>
    %60 = vector.multi_reduction <add>, %59, %cst_29 [0] : vector<2x4xf32> to vector<4xf32>
    %61 = vector.shape_cast %60 : vector<4xf32> to vector<1x4xf32>
    %cst_30 = arith.constant dense<0.000000e+00> : vector<4xf32>
    %62 = vector.multi_reduction <add>, %47, %cst_30 [0] : vector<16x4xf32> to vector<4xf32>
    %63 = vector.shape_cast %62 : vector<4xf32> to vector<1x4xf32>
    %cst_31 = arith.constant 1.600000e+01 : f32
    %64 = vector.broadcast %cst_31 : f32 to vector<1x4xf32>
    %65 = arith.divf %63, %64 : vector<1x4xf32>
    %66 = vector.broadcast %65 : vector<1x4xf32> to vector<16x4xf32>
    %67 = arith.subf %47, %66 : vector<16x4xf32>
    %68 = arith.mulf %67, %67 : vector<16x4xf32>
    %cst_32 = arith.constant dense<0.000000e+00> : vector<4xf32>
    %69 = vector.multi_reduction <add>, %68, %cst_32 [0] : vector<16x4xf32> to vector<4xf32>
    %70 = vector.shape_cast %69 : vector<4xf32> to vector<1x4xf32>
    %cst_33 = arith.constant 1.600000e+01 : f32
    %71 = vector.broadcast %cst_33 : f32 to vector<1x4xf32>
    %72 = arith.divf %70, %71 : vector<1x4xf32>
    %73 = vector.broadcast %65 : vector<1x4xf32> to vector<16x4xf32>
    %74 = arith.subf %47, %73 : vector<16x4xf32>
    %cst_34 = arith.constant 9.99999974E-6 : f32
    %75 = vector.broadcast %cst_34 : f32 to vector<1x4xf32>
    %76 = arith.addf %72, %75 : vector<1x4xf32>
    %77 = math.rsqrt %76 : vector<1x4xf32>
    %78 = vector.broadcast %77 : vector<1x4xf32> to vector<16x4xf32>
    %79 = arith.mulf %74, %78 : vector<16x4xf32>
    %80 = vector.broadcast %54 : vector<1x4xf32> to vector<16x4xf32>
    %81 = arith.mulf %79, %80 : vector<16x4xf32>
    %82 = vector.broadcast %61 : vector<1x4xf32> to vector<16x4xf32>
    %83 = arith.addf %81, %82 : vector<16x4xf32>
    %c0_35 = arith.constant 0 : index
    %c0_36 = arith.constant 0 : index
    %84 = vector.load %arg9[%c0_35, %c0_36] : memref<4x32xf32, #tpu.memory_space<vmem>>, vector<4x32xf32>
    %cst_37 = arith.constant dense<0.000000e+00> : vector<16x32xf32>
    %85 = tpu.matmul %83, %84, %cst_37 {dimension_numbers = #tpu.dot_dimension_numbers<[1], [0], [0], [1], [0, 0, 1, 1], [], []>} : vector<16x4xf32>, vector<4x32xf32>, vector<16x32xf32> -> vector<16x32xf32>
    %cst_38 = arith.constant 0.000000e+00 : f32
    %86 = vector.broadcast %cst_38 : f32 to vector<16x32xf32>
    %87 = arith.maximumf %85, %86 : vector<16x32xf32>
    %c0_39 = arith.constant 0 : index
    %c0_40 = arith.constant 0 : index
    %88 = vector.load %arg10[%c0_39, %c0_40] : memref<6x32xf32, #tpu.memory_space<vmem>>, vector<6x32xf32>
    %89 = tpu.iota {dimensions = array<i32: 0>} : vector<6x32xi32>
    %c0_i32_41 = arith.constant 0 : i32
    %90 = vector.broadcast %c0_i32_41 : i32 to vector<6x32xi32>
    %91 = arith.cmpi eq, %89, %90 : vector<6x32xi32>
    %cst_42 = arith.constant 0.000000e+00 : f32
    %92 = vector.broadcast %cst_42 : f32 to vector<6x32xf32>
    %93 = arith.select %91, %88, %92 : vector<6x32xi1>, vector<6x32xf32>
    %cst_43 = arith.constant dense<0.000000e+00> : vector<32xf32>
    %94 = vector.multi_reduction <add>, %93, %cst_43 [0] : vector<6x32xf32> to vector<32xf32>
    %95 = vector.shape_cast %94 : vector<32xf32> to vector<1x32xf32>
    %96 = tpu.iota {dimensions = array<i32: 0>} : vector<6x32xi32>
    %c1_i32_44 = arith.constant 1 : i32
    %97 = vector.broadcast %c1_i32_44 : i32 to vector<6x32xi32>
    %98 = arith.cmpi eq, %96, %97 : vector<6x32xi32>
    %cst_45 = arith.constant 0.000000e+00 : f32
    %99 = vector.broadcast %cst_45 : f32 to vector<6x32xf32>
    %100 = arith.select %98, %88, %99 : vector<6x32xi1>, vector<6x32xf32>
    %cst_46 = arith.constant dense<0.000000e+00> : vector<32xf32>
    %101 = vector.multi_reduction <add>, %100, %cst_46 [0] : vector<6x32xf32> to vector<32xf32>
    %102 = vector.shape_cast %101 : vector<32xf32> to vector<1x32xf32>
    %103 = tpu.iota {dimensions = array<i32: 0>} : vector<6x32xi32>
    %c2_i32 = arith.constant 2 : i32
    %104 = vector.broadcast %c2_i32 : i32 to vector<6x32xi32>
    %105 = arith.cmpi eq, %103, %104 : vector<6x32xi32>
    %cst_47 = arith.constant 0.000000e+00 : f32
    %106 = vector.broadcast %cst_47 : f32 to vector<6x32xf32>
    %107 = arith.select %105, %88, %106 : vector<6x32xi1>, vector<6x32xf32>
    %cst_48 = arith.constant dense<0.000000e+00> : vector<32xf32>
    %108 = vector.multi_reduction <add>, %107, %cst_48 [0] : vector<6x32xf32> to vector<32xf32>
    %109 = vector.shape_cast %108 : vector<32xf32> to vector<1x32xf32>
    %c0_49 = arith.constant 0 : index
    %c0_50 = arith.constant 0 : index
    %110 = vector.load %arg11[%c0_49, %c0_50] : memref<64x32xf32, #tpu.memory_space<vmem>>, vector<32x32xf32>
    %cst_51 = arith.constant dense<0.000000e+00> : vector<32xf32>
    %111 = vector.multi_reduction <add>, %87, %cst_51 [0] : vector<16x32xf32> to vector<32xf32>
    %112 = vector.shape_cast %111 : vector<32xf32> to vector<1x32xf32>
    %cst_52 = arith.constant 1.600000e+01 : f32
    %113 = vector.broadcast %cst_52 : f32 to vector<1x32xf32>
    %114 = arith.divf %112, %113 : vector<1x32xf32>
    %115 = vector.broadcast %114 : vector<1x32xf32> to vector<16x32xf32>
    %116 = arith.subf %87, %115 : vector<16x32xf32>
    %117 = arith.mulf %116, %116 : vector<16x32xf32>
    %cst_53 = arith.constant dense<0.000000e+00> : vector<32xf32>
    %118 = vector.multi_reduction <add>, %117, %cst_53 [0] : vector<16x32xf32> to vector<32xf32>
    %119 = vector.shape_cast %118 : vector<32xf32> to vector<1x32xf32>
    %cst_54 = arith.constant 1.600000e+01 : f32
    %120 = vector.broadcast %cst_54 : f32 to vector<1x32xf32>
    %121 = arith.divf %119, %120 : vector<1x32xf32>
    %122 = vector.broadcast %114 : vector<1x32xf32> to vector<16x32xf32>
    %123 = arith.subf %87, %122 : vector<16x32xf32>
    %cst_55 = arith.constant 9.99999974E-6 : f32
    %124 = vector.broadcast %cst_55 : f32 to vector<1x32xf32>
    %125 = arith.addf %121, %124 : vector<1x32xf32>
    %126 = math.rsqrt %125 : vector<1x32xf32>
    %127 = vector.broadcast %126 : vector<1x32xf32> to vector<16x32xf32>
    %128 = arith.mulf %123, %127 : vector<16x32xf32>
    %129 = vector.broadcast %95 : vector<1x32xf32> to vector<16x32xf32>
    %130 = arith.mulf %128, %129 : vector<16x32xf32>
    %131 = vector.broadcast %102 : vector<1x32xf32> to vector<16x32xf32>
    %132 = arith.addf %130, %131 : vector<16x32xf32>
    %cst_56 = arith.constant dense<0.000000e+00> : vector<16x32xf32>
    %133 = tpu.matmul %132, %110, %cst_56 {dimension_numbers = #tpu.dot_dimension_numbers<[1], [0], [0], [1], [0, 0, 1, 1], [], []>} : vector<16x32xf32>, vector<32x32xf32>, vector<16x32xf32> -> vector<16x32xf32>
    %134 = vector.broadcast %45 : vector<16x1xf32> to vector<16x32xf32>
    %135 = arith.mulf %134, %133 : vector<16x32xf32>
    %136 = arith.truncf %135 : vector<16x32xf32> to vector<16x32xbf16>
    %cst_57 = arith.constant dense<0.000000e+00> : vector<32x32xf32>
    %137 = tpu.matmul %7, %136, %cst_57 {dimension_numbers = #tpu.dot_dimension_numbers<[1], [0], [0], [1], [0, 0, 1, 1], [], []>} : vector<32x16xbf16>, vector<16x32xbf16>, vector<32x32xf32> -> vector<32x32xf32>
    %138 = arith.truncf %137 : vector<32x32xf32> to vector<32x32xbf16>
    %cst_58 = arith.constant dense<0.000000e+00> : vector<16x32xf32>
    %139 = tpu.matmul %31, %138, %cst_58 {dimension_numbers = #tpu.dot_dimension_numbers<[1], [0], [0], [1], [0, 0, 1, 1], [], []>} : vector<16x32xbf16>, vector<32x32xbf16>, vector<16x32xf32> -> vector<16x32xf32>
    %140 = arith.addf %139, %135 : vector<16x32xf32>
    %141 = vector.broadcast %45 : vector<16x1xf32> to vector<16x32xf32>
    %142 = arith.mulf %141, %140 : vector<16x32xf32>
    %143 = vector.broadcast %109 : vector<1x32xf32> to vector<16x32xf32>
    %144 = arith.addf %142, %143 : vector<16x32xf32>
    %cst_59 = arith.constant 0.000000e+00 : f32
    %145 = vector.broadcast %cst_59 : f32 to vector<16x32xf32>
    %146 = arith.maximumf %144, %145 : vector<16x32xf32>
    %147 = tpu.iota {dimensions = array<i32: 0>} : vector<6x32xi32>
    %c3_i32 = arith.constant 3 : i32
    %148 = vector.broadcast %c3_i32 : i32 to vector<6x32xi32>
    %149 = arith.cmpi eq, %147, %148 : vector<6x32xi32>
    %cst_60 = arith.constant 0.000000e+00 : f32
    %150 = vector.broadcast %cst_60 : f32 to vector<6x32xf32>
    %151 = arith.select %149, %88, %150 : vector<6x32xi1>, vector<6x32xf32>
    %cst_61 = arith.constant dense<0.000000e+00> : vector<32xf32>
    %152 = vector.multi_reduction <add>, %151, %cst_61 [0] : vector<6x32xf32> to vector<32xf32>
    %153 = vector.shape_cast %152 : vector<32xf32> to vector<1x32xf32>
    %154 = tpu.iota {dimensions = array<i32: 0>} : vector<6x32xi32>
    %c4_i32 = arith.constant 4 : i32
    %155 = vector.broadcast %c4_i32 : i32 to vector<6x32xi32>
    %156 = arith.cmpi eq, %154, %155 : vector<6x32xi32>
    %cst_62 = arith.constant 0.000000e+00 : f32
    %157 = vector.broadcast %cst_62 : f32 to vector<6x32xf32>
    %158 = arith.select %156, %88, %157 : vector<6x32xi1>, vector<6x32xf32>
    %cst_63 = arith.constant dense<0.000000e+00> : vector<32xf32>
    %159 = vector.multi_reduction <add>, %158, %cst_63 [0] : vector<6x32xf32> to vector<32xf32>
    %160 = vector.shape_cast %159 : vector<32xf32> to vector<1x32xf32>
    %161 = tpu.iota {dimensions = array<i32: 0>} : vector<6x32xi32>
    %c5_i32 = arith.constant 5 : i32
    %162 = vector.broadcast %c5_i32 : i32 to vector<6x32xi32>
    %163 = arith.cmpi eq, %161, %162 : vector<6x32xi32>
    %cst_64 = arith.constant 0.000000e+00 : f32
    %164 = vector.broadcast %cst_64 : f32 to vector<6x32xf32>
    %165 = arith.select %163, %88, %164 : vector<6x32xi1>, vector<6x32xf32>
    %cst_65 = arith.constant dense<0.000000e+00> : vector<32xf32>
    %166 = vector.multi_reduction <add>, %165, %cst_65 [0] : vector<6x32xf32> to vector<32xf32>
    %167 = vector.shape_cast %166 : vector<32xf32> to vector<1x32xf32>
    %c32 = arith.constant 32 : index
    %c0_66 = arith.constant 0 : index
    %168 = vector.load %arg11[%c32, %c0_66] : memref<64x32xf32, #tpu.memory_space<vmem>>, vector<32x32xf32>
    %cst_67 = arith.constant dense<0.000000e+00> : vector<32xf32>
    %169 = vector.multi_reduction <add>, %146, %cst_67 [0] : vector<16x32xf32> to vector<32xf32>
    %170 = vector.shape_cast %169 : vector<32xf32> to vector<1x32xf32>
    %cst_68 = arith.constant 1.600000e+01 : f32
    %171 = vector.broadcast %cst_68 : f32 to vector<1x32xf32>
    %172 = arith.divf %170, %171 : vector<1x32xf32>
    %173 = vector.broadcast %172 : vector<1x32xf32> to vector<16x32xf32>
    %174 = arith.subf %146, %173 : vector<16x32xf32>
    %175 = arith.mulf %174, %174 : vector<16x32xf32>
    %cst_69 = arith.constant dense<0.000000e+00> : vector<32xf32>
    %176 = vector.multi_reduction <add>, %175, %cst_69 [0] : vector<16x32xf32> to vector<32xf32>
    %177 = vector.shape_cast %176 : vector<32xf32> to vector<1x32xf32>
    %cst_70 = arith.constant 1.600000e+01 : f32
    %178 = vector.broadcast %cst_70 : f32 to vector<1x32xf32>
    %179 = arith.divf %177, %178 : vector<1x32xf32>
    %180 = vector.broadcast %172 : vector<1x32xf32> to vector<16x32xf32>
    %181 = arith.subf %146, %180 : vector<16x32xf32>
    %cst_71 = arith.constant 9.99999974E-6 : f32
    %182 = vector.broadcast %cst_71 : f32 to vector<1x32xf32>
    %183 = arith.addf %179, %182 : vector<1x32xf32>
    %184 = math.rsqrt %183 : vector<1x32xf32>
    %185 = vector.broadcast %184 : vector<1x32xf32> to vector<16x32xf32>
    %186 = arith.mulf %181, %185 : vector<16x32xf32>
    %187 = vector.broadcast %153 : vector<1x32xf32> to vector<16x32xf32>
    %188 = arith.mulf %186, %187 : vector<16x32xf32>
    %189 = vector.broadcast %160 : vector<1x32xf32> to vector<16x32xf32>
    %190 = arith.addf %188, %189 : vector<16x32xf32>
    %cst_72 = arith.constant dense<0.000000e+00> : vector<16x32xf32>
    %191 = tpu.matmul %190, %168, %cst_72 {dimension_numbers = #tpu.dot_dimension_numbers<[1], [0], [0], [1], [0, 0, 1, 1], [], []>} : vector<16x32xf32>, vector<32x32xf32>, vector<16x32xf32> -> vector<16x32xf32>
    %192 = vector.broadcast %45 : vector<16x1xf32> to vector<16x32xf32>
    %193 = arith.mulf %192, %191 : vector<16x32xf32>
    %194 = arith.truncf %193 : vector<16x32xf32> to vector<16x32xbf16>
    %cst_73 = arith.constant dense<0.000000e+00> : vector<32x32xf32>
    %195 = tpu.matmul %7, %194, %cst_73 {dimension_numbers = #tpu.dot_dimension_numbers<[1], [0], [0], [1], [0, 0, 1, 1], [], []>} : vector<32x16xbf16>, vector<16x32xbf16>, vector<32x32xf32> -> vector<32x32xf32>
    %196 = arith.truncf %195 : vector<32x32xf32> to vector<32x32xbf16>
    %cst_74 = arith.constant dense<0.000000e+00> : vector<16x32xf32>
    %197 = tpu.matmul %31, %196, %cst_74 {dimension_numbers = #tpu.dot_dimension_numbers<[1], [0], [0], [1], [0, 0, 1, 1], [], []>} : vector<16x32xbf16>, vector<32x32xbf16>, vector<16x32xf32> -> vector<16x32xf32>
    %198 = arith.addf %197, %193 : vector<16x32xf32>
    %199 = vector.broadcast %45 : vector<16x1xf32> to vector<16x32xf32>
    %200 = arith.mulf %199, %198 : vector<16x32xf32>
    %201 = vector.broadcast %167 : vector<1x32xf32> to vector<16x32xf32>
    %202 = arith.addf %200, %201 : vector<16x32xf32>
    %cst_75 = arith.constant 0.000000e+00 : f32
    %203 = vector.broadcast %cst_75 : f32 to vector<16x32xf32>
    %204 = arith.maximumf %202, %203 : vector<16x32xf32>
    %c0_76 = arith.constant 0 : index
    %c0_77 = arith.constant 0 : index
    %205 = vector.load %arg12[%c0_76, %c0_77] : memref<32x3xf32, #tpu.memory_space<vmem>>, vector<32x3xf32>
    %cst_78 = arith.constant dense<0.000000e+00> : vector<16x3xf32>
    %206 = tpu.matmul %204, %205, %cst_78 {dimension_numbers = #tpu.dot_dimension_numbers<[1], [0], [0], [1], [0, 0, 1, 1], [], []>} : vector<16x32xf32>, vector<32x3xf32>, vector<16x3xf32> -> vector<16x3xf32>
    %c0_79 = arith.constant 0 : index
    %c0_80 = arith.constant 0 : index
    %207 = vector.load %arg13[%c0_79, %c0_80] : memref<1x2xf32, #tpu.memory_space<vmem>>, vector<1x2xf32>
    %208 = tpu.iota {dimensions = array<i32: 1>} : vector<16x3xi32>
    %c0_i32_81 = arith.constant 0 : i32
    %209 = vector.broadcast %c0_i32_81 : i32 to vector<16x3xi32>
    %210 = arith.cmpi eq, %208, %209 : vector<16x3xi32>
    %cst_82 = arith.constant 0.000000e+00 : f32
    %211 = vector.broadcast %cst_82 : f32 to vector<16x3xf32>
    %212 = arith.select %210, %206, %211 : vector<16x3xi1>, vector<16x3xf32>
    %cst_83 = arith.constant dense<0.000000e+00> : vector<16xf32>
    %213 = vector.multi_reduction <add>, %212, %cst_83 [1] : vector<16x3xf32> to vector<16xf32>
    %214 = vector.shape_cast %213 : vector<16xf32> to vector<16x1xf32>
    %215 = tpu.iota {dimensions = array<i32: 1>} : vector<1x2xi32>
    %c0_i32_84 = arith.constant 0 : i32
    %216 = vector.broadcast %c0_i32_84 : i32 to vector<1x2xi32>
    %217 = arith.cmpi eq, %215, %216 : vector<1x2xi32>
    %cst_85 = arith.constant 0.000000e+00 : f32
    %218 = vector.broadcast %cst_85 : f32 to vector<1x2xf32>
    %219 = arith.select %217, %207, %218 : vector<1x2xi1>, vector<1x2xf32>
    %cst_86 = arith.constant dense<0.000000e+00> : vector<1xf32>
    %220 = vector.multi_reduction <add>, %219, %cst_86 [1] : vector<1x2xf32> to vector<1xf32>
    %221 = vector.shape_cast %220 : vector<1xf32> to vector<1x1xf32>
    %222 = vector.broadcast %221 : vector<1x1xf32> to vector<16x1xf32>
    %223 = arith.addf %214, %222 : vector<16x1xf32>
    %224 = tpu.iota {dimensions = array<i32: 1>} : vector<16x3xi32>
    %c1_i32_87 = arith.constant 1 : i32
    %225 = vector.broadcast %c1_i32_87 : i32 to vector<16x3xi32>
    %226 = arith.cmpi eq, %224, %225 : vector<16x3xi32>
    %cst_88 = arith.constant 0.000000e+00 : f32
    %227 = vector.broadcast %cst_88 : f32 to vector<16x3xf32>
    %228 = arith.select %226, %206, %227 : vector<16x3xi1>, vector<16x3xf32>
    %cst_89 = arith.constant dense<0.000000e+00> : vector<16xf32>
    %229 = vector.multi_reduction <add>, %228, %cst_89 [1] : vector<16x3xf32> to vector<16xf32>
    %230 = vector.shape_cast %229 : vector<16xf32> to vector<16x1xf32>
    %231 = tpu.iota {dimensions = array<i32: 1>} : vector<16x3xi32>
    %c2_i32_90 = arith.constant 2 : i32
    %232 = vector.broadcast %c2_i32_90 : i32 to vector<16x3xi32>
    %233 = arith.cmpi eq, %231, %232 : vector<16x3xi32>
    %cst_91 = arith.constant 0.000000e+00 : f32
    %234 = vector.broadcast %cst_91 : f32 to vector<16x3xf32>
    %235 = arith.select %233, %206, %234 : vector<16x3xi1>, vector<16x3xf32>
    %cst_92 = arith.constant dense<0.000000e+00> : vector<16xf32>
    %236 = vector.multi_reduction <add>, %235, %cst_92 [1] : vector<16x3xf32> to vector<16xf32>
    %237 = vector.shape_cast %236 : vector<16xf32> to vector<16x1xf32>
    %238 = tpu.iota {dimensions = array<i32: 1>} : vector<1x2xi32>
    %c1_i32_93 = arith.constant 1 : i32
    %239 = vector.broadcast %c1_i32_93 : i32 to vector<1x2xi32>
    %240 = arith.cmpi eq, %238, %239 : vector<1x2xi32>
    %cst_94 = arith.constant 0.000000e+00 : f32
    %241 = vector.broadcast %cst_94 : f32 to vector<1x2xf32>
    %242 = arith.select %240, %207, %241 : vector<1x2xi1>, vector<1x2xf32>
    %cst_95 = arith.constant dense<0.000000e+00> : vector<1xf32>
    %243 = vector.multi_reduction <add>, %242, %cst_95 [1] : vector<1x2xf32> to vector<1xf32>
    %244 = vector.shape_cast %243 : vector<1xf32> to vector<1x1xf32>
    %245 = vector.broadcast %244 : vector<1x1xf32> to vector<16x1xf32>
    %246 = arith.addf %237, %245 : vector<16x1xf32>
    %247 = arith.truncf %223 : vector<16x1xf32> to vector<16x1xbf16>
    %cst_96 = arith.constant dense<0.000000e+00> : vector<32x1xf32>
    %248 = tpu.matmul %7, %247, %cst_96 {dimension_numbers = #tpu.dot_dimension_numbers<[1], [0], [0], [1], [0, 0, 1, 1], [], []>} : vector<32x16xbf16>, vector<16x1xbf16>, vector<32x1xf32> -> vector<32x1xf32>
    %249 = arith.truncf %230 : vector<16x1xf32> to vector<16x1xbf16>
    %cst_97 = arith.constant dense<0.000000e+00> : vector<32x1xf32>
    %250 = tpu.matmul %15, %249, %cst_97 {dimension_numbers = #tpu.dot_dimension_numbers<[1], [0], [0], [1], [0, 0, 1, 1], [], []>} : vector<32x16xbf16>, vector<16x1xbf16>, vector<32x1xf32> -> vector<32x1xf32>
    %251 = arith.addf %248, %250 : vector<32x1xf32>
    %cst_98 = arith.constant 0.000000e+00 : f32
    %252 = vector.broadcast %cst_98 : f32 to vector<32x1xf32>
    %253 = arith.subf %252, %251 : vector<32x1xf32>
    %254 = math.exp %253 : vector<32x1xf32>
    %cst_99 = arith.constant 1.000000e+00 : f32
    %255 = vector.broadcast %cst_99 : f32 to vector<32x1xf32>
    %256 = arith.addf %255, %254 : vector<32x1xf32>
    %cst_100 = arith.constant 1.000000e+00 : f32
    %257 = vector.broadcast %cst_100 : f32 to vector<32x1xf32>
    %258 = arith.divf %257, %256 : vector<32x1xf32>
    %cst_101 = arith.constant 1.000000e+00 : f32
    %259 = vector.broadcast %cst_101 : f32 to vector<32x1xf32>
    %260 = arith.subf %259, %258 : vector<32x1xf32>
    %cst_102 = arith.constant 0.000000e+00 : f32
    %261 = vector.broadcast %cst_102 : f32 to vector<16x1xf32>
    %262 = arith.subf %261, %246 : vector<16x1xf32>
    %263 = math.exp %262 : vector<16x1xf32>
    %cst_103 = arith.constant 1.000000e+00 : f32
    %264 = vector.broadcast %cst_103 : f32 to vector<16x1xf32>
    %265 = arith.addf %264, %263 : vector<16x1xf32>
    %cst_104 = arith.constant 1.000000e+00 : f32
    %266 = vector.broadcast %cst_104 : f32 to vector<16x1xf32>
    %267 = arith.divf %266, %265 : vector<16x1xf32>
    %cst_105 = arith.constant 1.000000e+00 : f32
    %268 = vector.broadcast %cst_105 : f32 to vector<16x1xf32>
    %269 = arith.subf %268, %267 : vector<16x1xf32>
    %270 = arith.truncf %258 : vector<32x1xf32> to vector<32x1xbf16>
    %cst_106 = arith.constant dense<0.000000e+00> : vector<16x1xf32>
    %271 = tpu.matmul %23, %270, %cst_106 {dimension_numbers = #tpu.dot_dimension_numbers<[1], [0], [0], [1], [0, 0, 1, 1], [], []>} : vector<16x32xbf16>, vector<32x1xbf16>, vector<16x1xf32> -> vector<16x1xf32>
    %cst_107 = arith.constant 1.000000e+00 : f32
    %272 = vector.broadcast %cst_107 : f32 to vector<16x1xf32>
    %273 = arith.addf %271, %272 : vector<16x1xf32>
    %cst_108 = arith.constant 1.000000e+00 : f32
    %274 = vector.broadcast %cst_108 : f32 to vector<16x1xf32>
    %275 = arith.addf %40, %274 : vector<16x1xf32>
    %276 = arith.subf %275, %273 : vector<16x1xf32>
    %277 = math.rsqrt %273 : vector<16x1xf32>
    %278 = math.rsqrt %276 : vector<16x1xf32>
    %279 = vector.broadcast %267 : vector<16x1xf32> to vector<16x32xf32>
    %280 = arith.mulf %279, %204 : vector<16x32xf32>
    %281 = vector.broadcast %269 : vector<16x1xf32> to vector<16x32xf32>
    %282 = arith.mulf %281, %204 : vector<16x32xf32>
    %283 = tpu.concatenate %280, %282 in 1 : vector<16x32xf32>, vector<16x32xf32> -> vector<16x64xf32>
    %c0_109 = arith.constant 0 : index
    %c0_110 = arith.constant 0 : index
    %284 = vector.load %arg14[%c0_109, %c0_110] : memref<2x64xf32, #tpu.memory_space<vmem>>, vector<2x64xf32>
    %285 = tpu.iota {dimensions = array<i32: 0>} : vector<2x64xi32>
    %c0_i32_111 = arith.constant 0 : i32
    %286 = vector.broadcast %c0_i32_111 : i32 to vector<2x64xi32>
    %287 = arith.cmpi eq, %285, %286 : vector<2x64xi32>
    %cst_112 = arith.constant 0.000000e+00 : f32
    %288 = vector.broadcast %cst_112 : f32 to vector<2x64xf32>
    %289 = arith.select %287, %284, %288 : vector<2x64xi1>, vector<2x64xf32>
    %cst_113 = arith.constant dense<0.000000e+00> : vector<64xf32>
    %290 = vector.multi_reduction <add>, %289, %cst_113 [0] : vector<2x64xf32> to vector<64xf32>
    %291 = vector.shape_cast %290 : vector<64xf32> to vector<1x64xf32>
    %292 = tpu.iota {dimensions = array<i32: 0>} : vector<2x64xi32>
    %c1_i32_114 = arith.constant 1 : i32
    %293 = vector.broadcast %c1_i32_114 : i32 to vector<2x64xi32>
    %294 = arith.cmpi eq, %292, %293 : vector<2x64xi32>
    %cst_115 = arith.constant 0.000000e+00 : f32
    %295 = vector.broadcast %cst_115 : f32 to vector<2x64xf32>
    %296 = arith.select %294, %284, %295 : vector<2x64xi1>, vector<2x64xf32>
    %cst_116 = arith.constant dense<0.000000e+00> : vector<64xf32>
    %297 = vector.multi_reduction <add>, %296, %cst_116 [0] : vector<2x64xf32> to vector<64xf32>
    %298 = vector.shape_cast %297 : vector<64xf32> to vector<1x64xf32>
    %cst_117 = arith.constant dense<0.000000e+00> : vector<64xf32>
    %299 = vector.multi_reduction <add>, %283, %cst_117 [0] : vector<16x64xf32> to vector<64xf32>
    %300 = vector.shape_cast %299 : vector<64xf32> to vector<1x64xf32>
    %cst_118 = arith.constant 1.600000e+01 : f32
    %301 = vector.broadcast %cst_118 : f32 to vector<1x64xf32>
    %302 = arith.divf %300, %301 : vector<1x64xf32>
    %303 = vector.broadcast %302 : vector<1x64xf32> to vector<16x64xf32>
    %304 = arith.subf %283, %303 : vector<16x64xf32>
    %305 = arith.mulf %304, %304 : vector<16x64xf32>
    %cst_119 = arith.constant dense<0.000000e+00> : vector<64xf32>
    %306 = vector.multi_reduction <add>, %305, %cst_119 [0] : vector<16x64xf32> to vector<64xf32>
    %307 = vector.shape_cast %306 : vector<64xf32> to vector<1x64xf32>
    %cst_120 = arith.constant 1.600000e+01 : f32
    %308 = vector.broadcast %cst_120 : f32 to vector<1x64xf32>
    %309 = arith.divf %307, %308 : vector<1x64xf32>
    %310 = vector.broadcast %302 : vector<1x64xf32> to vector<16x64xf32>
    %311 = arith.subf %283, %310 : vector<16x64xf32>
    %cst_121 = arith.constant 9.99999974E-6 : f32
    %312 = vector.broadcast %cst_121 : f32 to vector<1x64xf32>
    %313 = arith.addf %309, %312 : vector<1x64xf32>
    %314 = math.rsqrt %313 : vector<1x64xf32>
    %315 = vector.broadcast %314 : vector<1x64xf32> to vector<16x64xf32>
    %316 = arith.mulf %311, %315 : vector<16x64xf32>
    %317 = vector.broadcast %291 : vector<1x64xf32> to vector<16x64xf32>
    %318 = arith.mulf %316, %317 : vector<16x64xf32>
    %319 = vector.broadcast %298 : vector<1x64xf32> to vector<16x64xf32>
    %320 = arith.addf %318, %319 : vector<16x64xf32>
    %c0_122 = arith.constant 0 : index
    %c0_123 = arith.constant 0 : index
    %321 = vector.load %arg15[%c0_122, %c0_123] : memref<64x64xf32, #tpu.memory_space<vmem>>, vector<64x64xf32>
    %cst_124 = arith.constant dense<0.000000e+00> : vector<16x64xf32>
    %322 = tpu.matmul %320, %321, %cst_124 {dimension_numbers = #tpu.dot_dimension_numbers<[1], [0], [0], [1], [0, 0, 1, 1], [], []>} : vector<16x64xf32>, vector<64x64xf32>, vector<16x64xf32> -> vector<16x64xf32>
    %323 = tpu.iota {dimensions = array<i32: 1>} : vector<16x64xi32>
    %c32_i32 = arith.constant 32 : i32
    %324 = vector.broadcast %c32_i32 : i32 to vector<16x64xi32>
    %325 = arith.cmpi slt, %323, %324 : vector<16x64xi32>
    %326 = vector.shape_cast %277 : vector<16x1xf32> to vector<16x1xf32>
    %327 = vector.broadcast %326 : vector<16x1xf32> to vector<16x64xf32>
    %328 = vector.shape_cast %278 : vector<16x1xf32> to vector<16x1xf32>
    %329 = vector.broadcast %328 : vector<16x1xf32> to vector<16x64xf32>
    %330 = arith.select %325, %327, %329 : vector<16x64xi1>, vector<16x64xf32>
    %331 = arith.mulf %330, %322 : vector<16x64xf32>
    %332 = arith.truncf %331 : vector<16x64xf32> to vector<16x64xbf16>
    %cst_125 = arith.constant dense<0.000000e+00> : vector<32x64xf32>
    %333 = tpu.matmul %7, %332, %cst_125 {dimension_numbers = #tpu.dot_dimension_numbers<[1], [0], [0], [1], [0, 0, 1, 1], [], []>} : vector<32x16xbf16>, vector<16x64xbf16>, vector<32x64xf32> -> vector<32x64xf32>
    %334 = tpu.iota {dimensions = array<i32: 1>} : vector<32x64xi32>
    %c32_i32_126 = arith.constant 32 : i32
    %335 = vector.broadcast %c32_i32_126 : i32 to vector<32x64xi32>
    %336 = arith.cmpi slt, %334, %335 : vector<32x64xi32>
    %337 = vector.shape_cast %258 : vector<32x1xf32> to vector<32x1xf32>
    %338 = vector.broadcast %337 : vector<32x1xf32> to vector<32x64xf32>
    %339 = vector.shape_cast %260 : vector<32x1xf32> to vector<32x1xf32>
    %340 = vector.broadcast %339 : vector<32x1xf32> to vector<32x64xf32>
    %341 = arith.select %336, %338, %340 : vector<32x64xi1>, vector<32x64xf32>
    %342 = arith.mulf %341, %333 : vector<32x64xf32>
    %343 = arith.truncf %342 : vector<32x64xf32> to vector<32x64xbf16>
    %cst_127 = arith.constant dense<0.000000e+00> : vector<16x64xf32>
    %344 = tpu.matmul %31, %343, %cst_127 {dimension_numbers = #tpu.dot_dimension_numbers<[1], [0], [0], [1], [0, 0, 1, 1], [], []>} : vector<16x32xbf16>, vector<32x64xbf16>, vector<16x64xf32> -> vector<16x64xf32>
    %345 = arith.addf %344, %331 : vector<16x64xf32>
    %346 = arith.mulf %330, %345 : vector<16x64xf32>
    %c0_128 = arith.constant 0 : index
    %c0_129 = arith.constant 0 : index
    %347 = vector.load %arg16[%c0_128, %c0_129] : memref<1x64xf32, #tpu.memory_space<vmem>>, vector<1x64xf32>
    %348 = vector.broadcast %347 : vector<1x64xf32> to vector<16x64xf32>
    %349 = arith.addf %346, %348 : vector<16x64xf32>
    %cst_130 = arith.constant 0.000000e+00 : f32
    %350 = vector.broadcast %cst_130 : f32 to vector<16x64xf32>
    %351 = arith.maximumf %349, %350 : vector<16x64xf32>
    %352 = arith.truncf %351 : vector<16x64xf32> to vector<16x64xbf16>
    %cst_131 = arith.constant dense<0.000000e+00> : vector<2x64xf32>
    %353 = tpu.matmul %39, %352, %cst_131 {dimension_numbers = #tpu.dot_dimension_numbers<[1], [0], [0], [1], [0, 0, 1, 1], [], []>} : vector<2x16xbf16>, vector<16x64xbf16>, vector<2x64xf32> -> vector<2x64xf32>
    %c0_132 = arith.constant 0 : index
    %c0_133 = arith.constant 0 : index
    %354 = vector.load %arg17[%c0_132, %c0_133] : memref<64x96xf32, #tpu.memory_space<vmem>>, vector<64x96xf32>
    %cst_134 = arith.constant dense<0.000000e+00> : vector<2x96xf32>
    %355 = tpu.matmul %353, %354, %cst_134 {dimension_numbers = #tpu.dot_dimension_numbers<[1], [0], [0], [1], [0, 0, 1, 1], [], []>} : vector<2x64xf32>, vector<64x96xf32>, vector<2x96xf32> -> vector<2x96xf32>
    %c0_135 = arith.constant 0 : index
    %c0_136 = arith.constant 0 : index
    %356 = vector.load %arg18[%c0_135, %c0_136] : memref<2x96xf32, #tpu.memory_space<vmem>>, vector<2x96xf32>
    %357 = tpu.iota {dimensions = array<i32: 0>} : vector<2x96xi32>
    %c0_i32_137 = arith.constant 0 : i32
    %358 = vector.broadcast %c0_i32_137 : i32 to vector<2x96xi32>
    %359 = arith.cmpi eq, %357, %358 : vector<2x96xi32>
    %cst_138 = arith.constant 0.000000e+00 : f32
    %360 = vector.broadcast %cst_138 : f32 to vector<2x96xf32>
    %361 = arith.select %359, %356, %360 : vector<2x96xi1>, vector<2x96xf32>
    %cst_139 = arith.constant dense<0.000000e+00> : vector<96xf32>
    %362 = vector.multi_reduction <add>, %361, %cst_139 [0] : vector<2x96xf32> to vector<96xf32>
    %363 = vector.shape_cast %362 : vector<96xf32> to vector<1x96xf32>
    %364 = tpu.iota {dimensions = array<i32: 0>} : vector<2x96xi32>
    %c1_i32_140 = arith.constant 1 : i32
    %365 = vector.broadcast %c1_i32_140 : i32 to vector<2x96xi32>
    %366 = arith.cmpi eq, %364, %365 : vector<2x96xi32>
    %cst_141 = arith.constant 0.000000e+00 : f32
    %367 = vector.broadcast %cst_141 : f32 to vector<2x96xf32>
    %368 = arith.select %366, %356, %367 : vector<2x96xi1>, vector<2x96xf32>
    %cst_142 = arith.constant dense<0.000000e+00> : vector<96xf32>
    %369 = vector.multi_reduction <add>, %368, %cst_142 [0] : vector<2x96xf32> to vector<96xf32>
    %370 = vector.shape_cast %369 : vector<96xf32> to vector<1x96xf32>
    %cst_143 = arith.constant dense<0.000000e+00> : vector<96xf32>
    %371 = vector.multi_reduction <add>, %355, %cst_143 [0] : vector<2x96xf32> to vector<96xf32>
    %372 = vector.shape_cast %371 : vector<96xf32> to vector<1x96xf32>
    %cst_144 = arith.constant 2.000000e+00 : f32
    %373 = vector.broadcast %cst_144 : f32 to vector<1x96xf32>
    %374 = arith.divf %372, %373 : vector<1x96xf32>
    %375 = vector.broadcast %374 : vector<1x96xf32> to vector<2x96xf32>
    %376 = arith.subf %355, %375 : vector<2x96xf32>
    %377 = arith.mulf %376, %376 : vector<2x96xf32>
    %cst_145 = arith.constant dense<0.000000e+00> : vector<96xf32>
    %378 = vector.multi_reduction <add>, %377, %cst_145 [0] : vector<2x96xf32> to vector<96xf32>
    %379 = vector.shape_cast %378 : vector<96xf32> to vector<1x96xf32>
    %cst_146 = arith.constant 2.000000e+00 : f32
    %380 = vector.broadcast %cst_146 : f32 to vector<1x96xf32>
    %381 = arith.divf %379, %380 : vector<1x96xf32>
    %382 = vector.broadcast %374 : vector<1x96xf32> to vector<2x96xf32>
    %383 = arith.subf %355, %382 : vector<2x96xf32>
    %cst_147 = arith.constant 9.99999974E-6 : f32
    %384 = vector.broadcast %cst_147 : f32 to vector<1x96xf32>
    %385 = arith.addf %381, %384 : vector<1x96xf32>
    %386 = math.rsqrt %385 : vector<1x96xf32>
    %387 = vector.broadcast %386 : vector<1x96xf32> to vector<2x96xf32>
    %388 = arith.mulf %383, %387 : vector<2x96xf32>
    %389 = vector.broadcast %363 : vector<1x96xf32> to vector<2x96xf32>
    %390 = arith.mulf %388, %389 : vector<2x96xf32>
    %391 = vector.broadcast %370 : vector<1x96xf32> to vector<2x96xf32>
    %392 = arith.addf %390, %391 : vector<2x96xf32>
    %c0_148 = arith.constant 0 : index
    %c0_149 = arith.constant 0 : index
    %393 = vector.load %arg19[%c0_148, %c0_149] : memref<96x96xf32, #tpu.memory_space<vmem>>, vector<96x96xf32>
    %cst_150 = arith.constant dense<0.000000e+00> : vector<2x96xf32>
    %394 = tpu.matmul %392, %393, %cst_150 {dimension_numbers = #tpu.dot_dimension_numbers<[1], [0], [0], [1], [0, 0, 1, 1], [], []>} : vector<2x96xf32>, vector<96x96xf32>, vector<2x96xf32> -> vector<2x96xf32>
    %c0_151 = arith.constant 0 : index
    %c0_152 = arith.constant 0 : index
    %395 = vector.load %arg20[%c0_151, %c0_152] : memref<1x96xf32, #tpu.memory_space<vmem>>, vector<1x96xf32>
    %396 = vector.broadcast %395 : vector<1x96xf32> to vector<2x96xf32>
    %397 = arith.addf %394, %396 : vector<2x96xf32>
    %cst_153 = arith.constant 0.000000e+00 : f32
    %398 = vector.broadcast %cst_153 : f32 to vector<2x96xf32>
    %399 = arith.maximumf %397, %398 : vector<2x96xf32>
    %c0_154 = arith.constant 0 : index
    %c0_155 = arith.constant 0 : index
    %400 = vector.load %arg21[%c0_154, %c0_155] : memref<2x96xf32, #tpu.memory_space<vmem>>, vector<2x96xf32>
    %401 = tpu.iota {dimensions = array<i32: 0>} : vector<2x96xi32>
    %c0_i32_156 = arith.constant 0 : i32
    %402 = vector.broadcast %c0_i32_156 : i32 to vector<2x96xi32>
    %403 = arith.cmpi eq, %401, %402 : vector<2x96xi32>
    %cst_157 = arith.constant 0.000000e+00 : f32
    %404 = vector.broadcast %cst_157 : f32 to vector<2x96xf32>
    %405 = arith.select %403, %400, %404 : vector<2x96xi1>, vector<2x96xf32>
    %cst_158 = arith.constant dense<0.000000e+00> : vector<96xf32>
    %406 = vector.multi_reduction <add>, %405, %cst_158 [0] : vector<2x96xf32> to vector<96xf32>
    %407 = vector.shape_cast %406 : vector<96xf32> to vector<1x96xf32>
    %408 = tpu.iota {dimensions = array<i32: 0>} : vector<2x96xi32>
    %c1_i32_159 = arith.constant 1 : i32
    %409 = vector.broadcast %c1_i32_159 : i32 to vector<2x96xi32>
    %410 = arith.cmpi eq, %408, %409 : vector<2x96xi32>
    %cst_160 = arith.constant 0.000000e+00 : f32
    %411 = vector.broadcast %cst_160 : f32 to vector<2x96xf32>
    %412 = arith.select %410, %400, %411 : vector<2x96xi1>, vector<2x96xf32>
    %cst_161 = arith.constant dense<0.000000e+00> : vector<96xf32>
    %413 = vector.multi_reduction <add>, %412, %cst_161 [0] : vector<2x96xf32> to vector<96xf32>
    %414 = vector.shape_cast %413 : vector<96xf32> to vector<1x96xf32>
    %cst_162 = arith.constant dense<0.000000e+00> : vector<96xf32>
    %415 = vector.multi_reduction <add>, %399, %cst_162 [0] : vector<2x96xf32> to vector<96xf32>
    %416 = vector.shape_cast %415 : vector<96xf32> to vector<1x96xf32>
    %cst_163 = arith.constant 2.000000e+00 : f32
    %417 = vector.broadcast %cst_163 : f32 to vector<1x96xf32>
    %418 = arith.divf %416, %417 : vector<1x96xf32>
    %419 = vector.broadcast %418 : vector<1x96xf32> to vector<2x96xf32>
    %420 = arith.subf %399, %419 : vector<2x96xf32>
    %421 = arith.mulf %420, %420 : vector<2x96xf32>
    %cst_164 = arith.constant dense<0.000000e+00> : vector<96xf32>
    %422 = vector.multi_reduction <add>, %421, %cst_164 [0] : vector<2x96xf32> to vector<96xf32>
    %423 = vector.shape_cast %422 : vector<96xf32> to vector<1x96xf32>
    %cst_165 = arith.constant 2.000000e+00 : f32
    %424 = vector.broadcast %cst_165 : f32 to vector<1x96xf32>
    %425 = arith.divf %423, %424 : vector<1x96xf32>
    %426 = vector.broadcast %418 : vector<1x96xf32> to vector<2x96xf32>
    %427 = arith.subf %399, %426 : vector<2x96xf32>
    %cst_166 = arith.constant 9.99999974E-6 : f32
    %428 = vector.broadcast %cst_166 : f32 to vector<1x96xf32>
    %429 = arith.addf %425, %428 : vector<1x96xf32>
    %430 = math.rsqrt %429 : vector<1x96xf32>
    %431 = vector.broadcast %430 : vector<1x96xf32> to vector<2x96xf32>
    %432 = arith.mulf %427, %431 : vector<2x96xf32>
    %433 = vector.broadcast %407 : vector<1x96xf32> to vector<2x96xf32>
    %434 = arith.mulf %432, %433 : vector<2x96xf32>
    %435 = vector.broadcast %414 : vector<1x96xf32> to vector<2x96xf32>
    %436 = arith.addf %434, %435 : vector<2x96xf32>
    %c0_167 = arith.constant 0 : index
    %c0_168 = arith.constant 0 : index
    %437 = vector.load %arg23[%c0_167, %c0_168] : memref<3x3xf32, #tpu.memory_space<vmem>>, vector<3x3xf32>
    %c0_169 = arith.constant 0 : index
    %c0_170 = arith.constant 0 : index
    %438 = vector.load %arg22[%c0_169, %c0_170] : memref<288x3xf32, #tpu.memory_space<vmem>>, vector<96x3xf32>
    %cst_171 = arith.constant dense<0.000000e+00> : vector<2x3xf32>
    %439 = tpu.matmul %436, %438, %cst_171 {dimension_numbers = #tpu.dot_dimension_numbers<[1], [0], [0], [1], [0, 0, 1, 1], [], []>} : vector<2x96xf32>, vector<96x3xf32>, vector<2x3xf32> -> vector<2x3xf32>
    %440 = tpu.iota {dimensions = array<i32: 0>} : vector<3x3xi32>
    %c0_i32_172 = arith.constant 0 : i32
    %441 = vector.broadcast %c0_i32_172 : i32 to vector<3x3xi32>
    %442 = arith.cmpi eq, %440, %441 : vector<3x3xi32>
    %cst_173 = arith.constant 0.000000e+00 : f32
    %443 = vector.broadcast %cst_173 : f32 to vector<3x3xf32>
    %444 = arith.select %442, %437, %443 : vector<3x3xi1>, vector<3x3xf32>
    %cst_174 = arith.constant dense<0.000000e+00> : vector<3xf32>
    %445 = vector.multi_reduction <add>, %444, %cst_174 [0] : vector<3x3xf32> to vector<3xf32>
    %446 = vector.shape_cast %445 : vector<3xf32> to vector<1x3xf32>
    %447 = vector.broadcast %446 : vector<1x3xf32> to vector<2x3xf32>
    %448 = arith.addf %439, %447 : vector<2x3xf32>
    %cst_175 = arith.constant dense<0xFF800000> : vector<2xf32>
    %449 = vector.multi_reduction <maximumf>, %448, %cst_175 [1] : vector<2x3xf32> to vector<2xf32>
    %450 = vector.shape_cast %449 : vector<2xf32> to vector<2x1xf32>
    %451 = vector.broadcast %450 : vector<2x1xf32> to vector<2x3xf32>
    %452 = arith.subf %448, %451 : vector<2x3xf32>
    %453 = math.exp %452 : vector<2x3xf32>
    %cst_176 = arith.constant dense<0.000000e+00> : vector<2xf32>
    %454 = vector.multi_reduction <add>, %453, %cst_176 [1] : vector<2x3xf32> to vector<2xf32>
    %455 = vector.shape_cast %454 : vector<2xf32> to vector<2x1xf32>
    %456 = math.log %455 : vector<2x1xf32>
    %457 = vector.broadcast %456 : vector<2x1xf32> to vector<2x3xf32>
    %458 = arith.subf %452, %457 : vector<2x3xf32>
    %c0_177 = arith.constant 0 : index
    %c0_178 = arith.constant 0 : index
    %459 = vector.load %arg24[%c0_177, %c0_178] : memref<2x3xf32, #tpu.memory_space<vmem>>, vector<2x3xf32>
    tpu.vector_store %arg24[%c0_177, %c0_178], %458 {strides = array<i32>} : memref<2x3xf32, #tpu.memory_space<vmem>>, vector<2x3xf32>,
    %c96 = arith.constant 96 : index
    %c0_179 = arith.constant 0 : index
    %460 = vector.load %arg22[%c96, %c0_179] : memref<288x3xf32, #tpu.memory_space<vmem>>, vector<96x3xf32>
    %cst_180 = arith.constant dense<0.000000e+00> : vector<2x3xf32>
    %461 = tpu.matmul %436, %460, %cst_180 {dimension_numbers = #tpu.dot_dimension_numbers<[1], [0], [0], [1], [0, 0, 1, 1], [], []>} : vector<2x96xf32>, vector<96x3xf32>, vector<2x3xf32> -> vector<2x3xf32>
    %462 = tpu.iota {dimensions = array<i32: 0>} : vector<3x3xi32>
    %c1_i32_181 = arith.constant 1 : i32
    %463 = vector.broadcast %c1_i32_181 : i32 to vector<3x3xi32>
    %464 = arith.cmpi eq, %462, %463 : vector<3x3xi32>
    %cst_182 = arith.constant 0.000000e+00 : f32
    %465 = vector.broadcast %cst_182 : f32 to vector<3x3xf32>
    %466 = arith.select %464, %437, %465 : vector<3x3xi1>, vector<3x3xf32>
    %cst_183 = arith.constant dense<0.000000e+00> : vector<3xf32>
    %467 = vector.multi_reduction <add>, %466, %cst_183 [0] : vector<3x3xf32> to vector<3xf32>
    %468 = vector.shape_cast %467 : vector<3xf32> to vector<1x3xf32>
    %469 = vector.broadcast %468 : vector<1x3xf32> to vector<2x3xf32>
    %470 = arith.addf %461, %469 : vector<2x3xf32>
    %cst_184 = arith.constant dense<0xFF800000> : vector<2xf32>
    %471 = vector.multi_reduction <maximumf>, %470, %cst_184 [1] : vector<2x3xf32> to vector<2xf32>
    %472 = vector.shape_cast %471 : vector<2xf32> to vector<2x1xf32>
    %473 = vector.broadcast %472 : vector<2x1xf32> to vector<2x3xf32>
    %474 = arith.subf %470, %473 : vector<2x3xf32>
    %475 = math.exp %474 : vector<2x3xf32>
    %cst_185 = arith.constant dense<0.000000e+00> : vector<2xf32>
    %476 = vector.multi_reduction <add>, %475, %cst_185 [1] : vector<2x3xf32> to vector<2xf32>
    %477 = vector.shape_cast %476 : vector<2xf32> to vector<2x1xf32>
    %478 = math.log %477 : vector<2x1xf32>
    %479 = vector.broadcast %478 : vector<2x1xf32> to vector<2x3xf32>
    %480 = arith.subf %474, %479 : vector<2x3xf32>
    %c0_186 = arith.constant 0 : index
    %c0_187 = arith.constant 0 : index
    %481 = vector.load %arg25[%c0_186, %c0_187] : memref<2x3xf32, #tpu.memory_space<vmem>>, vector<2x3xf32>
    tpu.vector_store %arg25[%c0_186, %c0_187], %480 {strides = array<i32>} : memref<2x3xf32, #tpu.memory_space<vmem>>, vector<2x3xf32>,
    %c192 = arith.constant 192 : index
    %c0_188 = arith.constant 0 : index
    %482 = vector.load %arg22[%c192, %c0_188] : memref<288x3xf32, #tpu.memory_space<vmem>>, vector<96x3xf32>
    %cst_189 = arith.constant dense<0.000000e+00> : vector<2x3xf32>
    %483 = tpu.matmul %436, %482, %cst_189 {dimension_numbers = #tpu.dot_dimension_numbers<[1], [0], [0], [1], [0, 0, 1, 1], [], []>} : vector<2x96xf32>, vector<96x3xf32>, vector<2x3xf32> -> vector<2x3xf32>
    %484 = tpu.iota {dimensions = array<i32: 0>} : vector<3x3xi32>
    %c2_i32_190 = arith.constant 2 : i32
    %485 = vector.broadcast %c2_i32_190 : i32 to vector<3x3xi32>
    %486 = arith.cmpi eq, %484, %485 : vector<3x3xi32>
    %cst_191 = arith.constant 0.000000e+00 : f32
    %487 = vector.broadcast %cst_191 : f32 to vector<3x3xf32>
    %488 = arith.select %486, %437, %487 : vector<3x3xi1>, vector<3x3xf32>
    %cst_192 = arith.constant dense<0.000000e+00> : vector<3xf32>
    %489 = vector.multi_reduction <add>, %488, %cst_192 [0] : vector<3x3xf32> to vector<3xf32>
    %490 = vector.shape_cast %489 : vector<3xf32> to vector<1x3xf32>
    %491 = vector.broadcast %490 : vector<1x3xf32> to vector<2x3xf32>
    %492 = arith.addf %483, %491 : vector<2x3xf32>
    %cst_193 = arith.constant dense<0xFF800000> : vector<2xf32>
    %493 = vector.multi_reduction <maximumf>, %492, %cst_193 [1] : vector<2x3xf32> to vector<2xf32>
    %494 = vector.shape_cast %493 : vector<2xf32> to vector<2x1xf32>
    %495 = vector.broadcast %494 : vector<2x1xf32> to vector<2x3xf32>
    %496 = arith.subf %492, %495 : vector<2x3xf32>
    %497 = math.exp %496 : vector<2x3xf32>
    %cst_194 = arith.constant dense<0.000000e+00> : vector<2xf32>
    %498 = vector.multi_reduction <add>, %497, %cst_194 [1] : vector<2x3xf32> to vector<2xf32>
    %499 = vector.shape_cast %498 : vector<2xf32> to vector<2x1xf32>
    %500 = math.log %499 : vector<2x1xf32>
    %501 = vector.broadcast %500 : vector<2x1xf32> to vector<2x3xf32>
    %502 = arith.subf %496, %501 : vector<2x3xf32>
    %c0_195 = arith.constant 0 : index
    %c0_196 = arith.constant 0 : index
    %503 = vector.load %arg26[%c0_195, %c0_196] : memref<2x3xf32, #tpu.memory_space<vmem>>, vector<2x3xf32>
    tpu.vector_store %arg26[%c0_195, %c0_196], %502 {strides = array<i32>} : memref<2x3xf32, #tpu.memory_space<vmem>>, vector<2x3xf32>,
    return
  }
  func.func @transform_0(%arg0: i32) -> (i32, i32) {
    %c0_i32 = arith.constant 0 : i32
    %c0_i32_0 = arith.constant 0 : i32
    %c0_i32_1 = arith.constant 0 : i32
    return %c0_i32, %c0_i32_0 : i32, i32
  }
  func.func @transform_1(%arg0: i32) -> (i32, i32) {
    %c0_i32 = arith.constant 0 : i32
    %c0_i32_0 = arith.constant 0 : i32
    %c0_i32_1 = arith.constant 0 : i32
    return %c0_i32, %c0_i32_0 : i32, i32
  }
  func.func @transform_2(%arg0: i32) -> (i32, i32) {
    %c0_i32 = arith.constant 0 : i32
    %c0_i32_0 = arith.constant 0 : i32
    %c0_i32_1 = arith.constant 0 : i32
    return %c0_i32, %c0_i32_0 : i32, i32
  }
  func.func @transform_3(%arg0: i32) -> (i32, i32) {
    %c0_i32 = arith.constant 0 : i32
    %c0_i32_0 = arith.constant 0 : i32
    %c0_i32_1 = arith.constant 0 : i32
    return %c0_i32, %c0_i32_0 : i32, i32
  }
  func.func @transform_4(%arg0: i32) -> (i32, i32) {
    %c0_i32 = arith.constant 0 : i32
    %c0_i32_0 = arith.constant 0 : i32
    %c0_i32_1 = arith.constant 0 : i32
    return %c0_i32, %c0_i32_0 : i32, i32
  }
  func.func @transform_5(%arg0: i32) -> (i32, i32) {
    %c0_i32 = arith.constant 0 : i32
    %c0_i32_0 = arith.constant 0 : i32
    %c0_i32_1 = arith.constant 0 : i32
    return %c0_i32, %c0_i32_0 : i32, i32
  }
  func.func @transform_6(%arg0: i32) -> (i32, i32) {
    %c0_i32 = arith.constant 0 : i32
    %c0_i32_0 = arith.constant 0 : i32
    %c0_i32_1 = arith.constant 0 : i32
    return %c0_i32, %c0_i32_0 : i32, i32
  }
  func.func @transform_7(%arg0: i32) -> (i32, i32) {
    %c0_i32 = arith.constant 0 : i32
    %c0_i32_0 = arith.constant 0 : i32
    %c0_i32_1 = arith.constant 0 : i32
    return %c0_i32, %c0_i32_0 : i32, i32
  }
  func.func @transform_8(%arg0: i32) -> (i32, i32) {
    %c0_i32 = arith.constant 0 : i32
    %c0_i32_0 = arith.constant 0 : i32
    %c0_i32_1 = arith.constant 0 : i32
    return %c0_i32, %c0_i32_0 : i32, i32
  }
  func.func @transform_9(%arg0: i32) -> (i32, i32) {
    %c0_i32 = arith.constant 0 : i32
    %c0_i32_0 = arith.constant 0 : i32
    %c0_i32_1 = arith.constant 0 : i32
    return %c0_i32, %c0_i32_0 : i32, i32
  }
  func.func @transform_10(%arg0: i32) -> (i32, i32) {
    %c0_i32 = arith.constant 0 : i32
    %c0_i32_0 = arith.constant 0 : i32
    %c0_i32_1 = arith.constant 0 : i32
    return %c0_i32, %c0_i32_0 : i32, i32
  }
  func.func @transform_11(%arg0: i32) -> (i32, i32) {
    %c0_i32 = arith.constant 0 : i32
    %c0_i32_0 = arith.constant 0 : i32
    %c0_i32_1 = arith.constant 0 : i32
    return %c0_i32, %c0_i32_0 : i32, i32
  }
  func.func @transform_12(%arg0: i32) -> (i32, i32) {
    %c0_i32 = arith.constant 0 : i32
    %c0_i32_0 = arith.constant 0 : i32
    %c0_i32_1 = arith.constant 0 : i32
    return %c0_i32, %c0_i32_0 : i32, i32
  }
  func.func @transform_13(%arg0: i32) -> (i32, i32) {
    %c0_i32 = arith.constant 0 : i32
    %c0_i32_0 = arith.constant 0 : i32
    %c0_i32_1 = arith.constant 0 : i32
    return %c0_i32, %c0_i32_0 : i32, i32
  }
  func.func @transform_14(%arg0: i32) -> (i32, i32) {
    %c0_i32 = arith.constant 0 : i32
    %c0_i32_0 = arith.constant 0 : i32
    %c0_i32_1 = arith.constant 0 : i32
    return %c0_i32, %c0_i32_0 : i32, i32
  }
  func.func @transform_15(%arg0: i32) -> (i32, i32) {
    %c0_i32 = arith.constant 0 : i32
    %c0_i32_0 = arith.constant 0 : i32
    %c0_i32_1 = arith.constant 0 : i32
    return %c0_i32, %c0_i32_0 : i32, i32
  }
  func.func @transform_16(%arg0: i32) -> (i32, i32) {
    %c0_i32 = arith.constant 0 : i32
    %c0_i32_0 = arith.constant 0 : i32
    %c0_i32_1 = arith.constant 0 : i32
    return %c0_i32, %c0_i32_0 : i32, i32
  }
  func.func @transform_17(%arg0: i32) -> (i32, i32) {
    %c0_i32 = arith.constant 0 : i32
    %c0_i32_0 = arith.constant 0 : i32
    %c0_i32_1 = arith.constant 0 : i32
    return %c0_i32, %c0_i32_0 : i32, i32
  }
  func.func @transform_18(%arg0: i32) -> (i32, i32) {
    %c0_i32 = arith.constant 0 : i32
    %c0_i32_0 = arith.constant 0 : i32
    %c0_i32_1 = arith.constant 0 : i32
    return %c0_i32, %c0_i32_0 : i32, i32
  }
  func.func @transform_19(%arg0: i32) -> (i32, i32) {
    %c0_i32 = arith.constant 0 : i32
    %c0_i32_0 = arith.constant 0 : i32
    %c0_i32_1 = arith.constant 0 : i32
    return %c0_i32, %c0_i32_0 : i32, i32
  }
  func.func @transform_20(%arg0: i32) -> (i32, i32) {
    %c0_i32 = arith.constant 0 : i32
    %c0_i32_0 = arith.constant 0 : i32
    %c0_i32_1 = arith.constant 0 : i32
    return %c0_i32, %c0_i32_0 : i32, i32
  }
  func.func @transform_21(%arg0: i32) -> (i32, i32) {
    %c0_i32 = arith.constant 0 : i32
    %c0_i32_0 = arith.constant 0 : i32
    %c0_i32_1 = arith.constant 0 : i32
    return %c0_i32, %c0_i32_0 : i32, i32
  }
  func.func @transform_22(%arg0: i32) -> (i32, i32) {
    %c0_i32 = arith.constant 0 : i32
    %c0_i32_0 = arith.constant 0 : i32
    %c0_i32_1 = arith.constant 0 : i32
    return %c0_i32, %c0_i32_0 : i32, i32
  }
  func.func @transform_23(%arg0: i32) -> (i32, i32) {
    %c0_i32 = arith.constant 0 : i32
    %c0_i32_0 = arith.constant 0 : i32
    %c0_i32_1 = arith.constant 0 : i32
    return %c0_i32, %c0_i32_0 : i32, i32
  }
  func.func @transform_24(%arg0: i32) -> (i32, i32) {
    %c0_i32 = arith.constant 0 : i32
    %c0_i32_0 = arith.constant 0 : i32
    %c0_i32_1 = arith.constant 0 : i32
    return %c0_i32, %c0_i32_0 : i32, i32
  }
  func.func @transform_25(%arg0: i32) -> (i32, i32) {
    %c0_i32 = arith.constant 0 : i32
    %c0_i32_0 = arith.constant 0 : i32
    %c0_i32_1 = arith.constant 0 : i32
    return %c0_i32, %c0_i32_0 : i32, i32
  }
}

</mosaic_0001>

<bundles_post_ra>
// kernel: causal_gcn_forward.1
= control target key start
LH: loop header
LB: loop body
LE: loop exit
PB: predicated region body
PF: predicated region fallthrough
CT: control target
= control target key end

     0   :  { %s3645_s0 = inlined_call_operand.vmem [shape: f32[16,4], index: 0, kind: input, shape index: {}]   ;;  %s3646_s1 = inlined_call_operand.vmem [shape: s32[32,1], index: 1, kind: input, shape index: {}]   ;;  %s3647_s2 = inlined_call_operand.vmem [shape: s32[1,32], index: 2, kind: input, shape index: {}]   ;;  %s3648_s3 = inlined_call_operand.vmem [shape: s32[32,1], index: 3, kind: input, shape index: {}]   ;;  %s3649_s4 = inlined_call_operand.vmem [shape: s32[1,32], index: 4, kind: input, shape index: {}]   ;;  %s3650_s5 = inlined_call_operand.vmem [shape: s32[1,16], index: 5, kind: input, shape index: {}]   ;;  %s3651_s6 = inlined_call_operand.vmem [shape: f32[16,1], index: 6, kind: input, shape index: {}]   ;;  %s3652_s7 = inlined_call_operand.vmem [shape: f32[2,4], index: 7, kind: input, shape index: {}]   ;;  %s3653_s8 = inlined_call_operand.vmem [shape: f32[4,32], index: 8, kind: input, shape index: {}]   ;;  %s3654_s9 = inlined_call_operand.vmem [shape: f32[6,32], index: 9, kind: input, shape index: {}]   ;;  %s3655_s10 = inlined_call_operand.vmem [shape: f32[64,32], index: 10, kind: input, shape index: {}]   ;;  %s3656_s11 = inlined_call_operand.vmem [shape: f32[32,3], index: 11, kind: input, shape index: {}]   ;;  %s3657_s12 = inlined_call_operand.vmem [shape: f32[1,2], index: 12, kind: input, shape index: {}]   ;;  %s3658_s13 = inlined_call_operand.vmem [shape: f32[2,64], index: 13, kind: input, shape index: {}]   ;;  %s3659_s14 = inlined_call_operand.vmem [shape: f32[64,64], index: 14, kind: input, shape index: {}]   ;;  %s3660_s15 = inlined_call_operand.vmem [shape: f32[1,64], index: 15, kind: input, shape index: {}]   ;;  %s3661_s16 = inlined_call_operand.vmem [shape: f32[64,96], index: 16, kind: input, shape index: {}]   ;;  %s3662_s17 = inlined_call_operand.vmem [shape: f32[2,96], index: 17, kind: input, shape index: {}]   ;;  %s3663_s18 = inlined_call_operand.vmem [shape: f32[96,96], index: 18, kind: input, shape index: {}]   ;;  %s3664_s19 = inlined_call_operand.vmem [shape: f32[1,96], index: 19, kind: input, shape index: {}]   ;;  %s3665_s20 = inlined_call_operand.vmem [shape: f32[2,96], index: 20, kind: input, shape index: {}]   ;;  %s3666_s21 = inlined_call_operand.vmem [shape: f32[288,3], index: 21, kind: input, shape index: {}]   ;;  %s3667_s22 = inlined_call_operand.vmem [shape: f32[3,3], index: 22, kind: input, shape index: {}]   ;;  %s3668_s23 = inlined_call_operand.hbm [shape: f32[2,3], index: 23, kind: output, shape index: {0}]   ;;  %s3669_s24 = inlined_call_operand.hbm [shape: f32[2,3], index: 24, kind: output, shape index: {1}]   ;;  %s3670_s25 = inlined_call_operand.hbm [shape: f32[2,3], index: 25, kind: output, shape index: {2}]  }
   0x1   :  { %3675 = sst [smem:[#allocation9_spill]] %s3645_s0 }
   0x2   :  { %3676 = sst [smem:[#allocation10_spill]] %s3646_s1 }
   0x3   :  { %3677 = sst [smem:[#allocation11_spill]] %s3647_s2 }
   0x4   :  { %3678 = sst [smem:[#allocation12_spill]] %s3648_s3 }
   0x5   :  { %3679 = sst [smem:[#allocation13_spill]] %s3649_s4 }
   0x6   :  { %3680 = sst [smem:[#allocation14_spill]] %s3650_s5 }
   0x7   :  { %3681 = sst [smem:[#allocation15_spill]] %s3651_s6 }
   0x8   :  { %3682 = sst [smem:[#allocation16_spill]] %s3652_s7 }
   0x9   :  { %3683 = sst [smem:[#allocation17_spill]] %s3653_s8 }
   0xa   :  { %3684 = sst [smem:[#allocation18_spill]] %s3654_s9 }
   0xb   :  { %31 = vsyncpa [#allocation3], 0  ;;  %s3685_s6 = sld [smem:[#allocation17_spill]]  ;;  %vm236_vm0 = vcmask 1043456   ;;  %vm195_vm1 = vcmask 31744  }
   0xc   :  { %s3686_s3 = sld [smem:[#allocation9_spill]] }
  0x11   :  { %v229_v0 = vld [vmem:[%s3685_s6] sm:$0xf] }
  0x12   :  { %v174_v1 = vld [vmem:[%s3686_s3] sm:$0xff]  ;;  %2312 = vmatprep.subr.msk.mxu0 %vm236_vm0, %v229_v0  ;;  %v175_v2 = vld [vmem:[%s3686_s3 + $0x8] sm:$0xff] }
  0x13   :  { %32 = vsyncpa [#allocation5], 0  ;;  %2313 = vmatpush3.msk.msra.mxu0 %vm236_vm0, %v229_v0  ;;  %v196_v3 = vsel %vm195_vm1, %v174_v1, 0.0  ;;  %v197_v4 = vsel %vm195_vm1, %v175_v2, 0.0  ;;  %v84_v11 = vlaneseq  ;;  %s3687_s4 = sld [smem:[#allocation16_spill]]  ;;  %vm178_vm4 = vcmask 25600  }
  0x14   :  { %v198_v5 = vadd.f32 %v197_v4, %v196_v3  ;;  %v344_v54 = vld [vmem:[%s3655_s10] sm:$0xff]  ;;  %v345_v55 = vld [vmem:[%s3655_s10 + $0x8] sm:$0xff]  ;;  %v346_v57 = vld [vmem:[%s3655_s10 + $0x10] sm:$0xff]  ;;  %s3688_s26 = sld [smem:[#allocation15_spill]]  ;;  %v2832_v62 = vmov 0   ;;  %s3689_s28 = sld [smem:[#allocation10_spill]] }
  0x15   :  { %v2982_v14 = vshrl.u32 %v84_v11, 7  ;;  %v2564_v56 = vpack.c.bf16 %v345_v55, %v344_v54  ;;  %v347_v58 = vld [vmem:[%s3655_s10 + $0x18] sm:$0xff]  ;;  %2701 = vset.pattern.permute.xlu0 %v2832_v62  ;;  %2700 = vset.pattern.permute.xlu1 %v2832_v62  ;;  %s3690_s30 = sld [smem:[#allocation12_spill]]  ;;  %vm925_vm8 = vcmask 8192   ;;  %vm348_vm9 = vcmask 261120   ;;  %s3692_s0 = sld [smem:[#allocation13_spill]] }
  0x16   :  { %v199_v6 = vrot.slane %v198_v5, 4  ;;  %v2568_v59 = vpack.c.bf16 %v347_v58, %v346_v57  ;;  %vm319_vm10 = vcmask 259072   ;;  %vm475_vm13 = vcmask 130048   ;;  %s3693_s1 = sld [smem:[#allocation11_spill]]  ;;  %s3694_s3 = sld [smem:[#allocation14_spill]] }
  0x17   :  { %vm176_vm2 = vcmp.eq.s32.totalorder %v2982_v14, 0  ;;  %vm186_vm3 = vcmp.eq.s32.totalorder %v2982_v14, 1  ;;  %2565 = vmatprep.subr.bf16.mxu1 %v2564_v56  ;;  %vm2834_vm0 = vmmov 0  }
  0x18   :  { %v200_v7 = vadd.f32 %v199_v6, %v198_v5  ;;  %2567 = vmatpush3.bf16.msra.mxu1 %v2564_v56 }
  0x19   :  { %v173_v19 = vld [vmem:[%s3687_s4] sm:$0x3]  ;;  %2569 = vmatprep.subr.bf16.mxu1 %v2568_v59 }
  0x1a   :  { %v201_v8 = vrot.slane %v200_v7, 2  ;;  %v177_v23 = vsel %vm176_vm2, %v173_v19, 0.0  ;;  %v187_v25 = vsel %vm186_vm3, %v173_v19, 0.0  ;;  %v3012_v60 = vld [vmem:[%s3688_s26] sm:$0xff]  ;;  %v3017_v61 = vld [vmem:[%s3688_s26 + $0x8] sm:$0xff] }
  0x1b   :  { %v179_v26 = vsel %vm178_vm4, %v177_v23, 0.0  ;;  %v188_v28 = vsel %vm178_vm4, %v187_v25, 0.0  ;;  %v80_v63 = vld [vmem:[%s3689_s28] sm:$0xff]  ;;  %v81_v0 = vld [vmem:[%s3689_s28 + $0x8] sm:$0xff]  ;;  %vm167_vm5 = vcmp.gt.f32.partialorder %v3012_v60, 0.0  ;;  %vm168_vm6 = vcmp.gt.f32.partialorder %v3017_v61, 0.0 }
  0x1c   :  { %v202_v9 = vadd.f32 %v201_v8, %v200_v7  ;;  %v180_v30 = vrot.slane %v179_v26, 4  ;;  %v189_v32 = vrot.slane %v188_v28, 4  ;;  %2571 = vmatpush3.bf16.msra.mxu1 %v2568_v59  ;;  %87 = vperm.xlu1 %2700, %v80_v63   ;;  %v109_v3 = vld [vmem:[%s3690_s30 + $0x8] sm:$0xff]  ;;  %v82_v7 = vld [vmem:[%s3689_s28 + $0x10] sm:$0xff]  ;;  %v3039_v8 = vand.u32 127, %v84_v11 }
  0x1e   :  { %v203_v10 = vrot.slane %v202_v9, 1  ;;  %v181_v34 = vadd.f32 %v180_v30, %v179_v26  ;;  %v190_v36 = vadd.f32 %v189_v32, %v188_v28  ;;  %vm914_vm7 = vcmp.eq.s32.totalorder %v3039_v8, 0 }
  0x20   :  { %v204_v12 = vadd.f32 %v203_v10, %v202_v9  ;;  %v182_v38 = vrot.slane %v181_v34, 2  ;;  %v191_v40 = vrot.slane %v190_v36, 2  ;;  %90 = vperm.xlu1 %2700, %v81_v0   ;;  %v3044_v9 = vld [vmem:[%s3657_s12] sm:$0x1] }
  0x21   :  { %v924_v10 = vsel %vm914_vm7, %v3044_v9, 0.0 }
  0x22   :  { %v206_v13 = vmul.f32 0.0625, %v204_v12  ;;  %v183_v41 = vadd.f32 %v182_v38, %v181_v34  ;;  %v192_v42 = vadd.f32 %v191_v40, %v190_v36  ;;  %v926_v12 = vsel %vm925_vm8, %v924_v10, 0.0 }
  0x24   :  { %v207_v15 = vsub.f32 %v174_v1, %v206_v13  ;;  %v208_v16 = vsub.f32 %v175_v2, %v206_v13  ;;  %v184_v43 = vrot.slane %v183_v41, 1  ;;  %v193_v44 = vrot.slane %v192_v42, 1  ;;  %v83_v1 = vld [vmem:[%s3689_s28 + $0x18] sm:$0xff]  ;;  %s3691_s28 = sld [smem:[#allocation18_spill]] }
  0x25   :  { %96 = vperm.xlu1 %2700, %v83_v1  }
  0x26   :  { %v209_v17 = vmul.f32 %v207_v15, %v207_v15  ;;  %v210_v18 = vmul.f32 %v208_v16, %v208_v16  ;;  %v185_v45 = vadd.f32 %v184_v43, %v183_v41  ;;  %v194_v47 = vadd.f32 %v193_v44, %v192_v42 }
  0x28   :  { %v211_v20 = vsel %vm195_vm1, %v209_v17, 0.0  ;;  %v212_v21 = vsel %vm195_vm1, %v210_v18, 0.0 }
  0x29   :  { %v213_v22 = vadd.f32 %v212_v21, %v211_v20  ;;  %116 = vperm.xlu1 %2700, %v109_v3   ;;  %v108_v20 = vld [vmem:[%s3690_s30] sm:$0xff] }
  0x2a   :  { %v3059_v32 = vld [vmem:[%s3691_s28] sm:$0x3f] }
  0x2b   :  { %v214_v24 = vrot.slane %v213_v22, 4  ;;  %v318_v36 = vsel %vm176_vm2, %v3059_v32, 0.0  ;;  %v327_v38 = vsel %vm186_vm3, %v3059_v32, 0.0 }
  0x2c   :  { %v320_v40 = vsel %vm319_vm10, %v318_v36, 0.0  ;;  %v328_v42 = vsel %vm319_vm10, %v327_v38, 0.0  ;;  %v610_v38 = vld [vmem:[%s3655_s10 + $0x20] sm:$0xff] }
  0x2d   :  { %v215_v27 = vadd.f32 %v214_v24, %v213_v22  ;;  %v321_v43 = vrot.slane %v320_v40, 4 }
  0x2f   :  { %v216_v29 = vrot.slane %v215_v27, 2 }
  0x31   :  { %v217_v31 = vadd.f32 %v216_v29, %v215_v27 }
  0x33   :  { %v218_v33 = vrot.slane %v217_v31, 1 }
  0x35   :  { %v219_v35 = vadd.f32 %v218_v33, %v217_v31 }
  0x37   :  { %v220_v37 = vmul.f32 0.0625, %v219_v35 }
  0x39   :  { %v221_v39 = vadd.f32 1e-05, %v220_v37 }
  0x3b   :  { %2702 = vrsqrt.f32 %v221_v39 }
  0x3c   :  { %2704 = vrsqrt.f32 %v3012_v60 }
  0x3d   :  { %2706 = vrsqrt.f32 %v3017_v61 }
  0x45   :  { %v2703_v46 = vpop.eup %2702 }
  0x46   :  { %v223_v48 = vmul.f32 %v2703_v46, %v207_v15  ;;  %v224_v49 = vmul.f32 %v2703_v46, %v208_v16  ;;  %v2705_v2 = vpop.eup %2704 }
  0x47   :  { %v2707_v4 = vpop.eup %2706  ;;  %v171_v5 = vsel %vm167_vm5, %v2705_v2, 0.0  ;;  %vm335_vm5 = vcmp.eq.s32.totalorder %v2982_v14, 2 }
  0x48   :  { %v225_v50 = vmul.f32 %v223_v48, %v185_v45  ;;  %v226_v51 = vmul.f32 %v224_v49, %v185_v45  ;;  %464 = vperm.xlu0 %2701, %v171_v5   ;;  %v172_v6 = vsel %vm168_vm6, %v2707_v4, 0.0  ;;  %v329_v45 = vrot.slane %v328_v42, 4 }
  0x49   :  { %vm583_vm6 = vcmp.eq.s32.totalorder %v2982_v14, 3 }
  0x4a   :  { %v227_v52 = vadd.f32 %v225_v50, %v194_v47  ;;  %v228_v53 = vadd.f32 %v226_v51, %v194_v47  ;;  %v322_v47 = vadd.f32 %v321_v43, %v320_v40  ;;  %v330_v49 = vadd.f32 %v329_v45, %v328_v42  ;;  %v613_v42 = vld [vmem:[%s3655_s10 + $0x38] sm:$0xff] }
  0x4c   :  { %2314 = vmatprep.mubr.msk.f32.mxu0 %vm195_vm1, %v227_v52  ;;  %469 = vperm.xlu0 %2701, %v172_v6   ;;  %v323_v51 = vrot.slane %v322_v47, 2 }
  0x4d   :  { %2315 = vmatmul.mubr.msk.f32.vlgmr.msra.gmra.mrb[0].mxu0 %vm195_vm1, %v228_v53  ;;  %v331_v53 = vrot.slane %v330_v49, 2 }
  0x4e   :  { %v324_v54 = vadd.f32 %v323_v51, %v322_v47 }
  0x4f   :  { %v332_v55 = vadd.f32 %v331_v53, %v330_v49 }
  0x50   :  { %93 = vperm.xlu0 %2701, %v82_v7   ;;  %v325_v56 = vrot.slane %v324_v54, 1  ;;  %v2833_v7 = vmov 0.0  }
  0x51   :  { %v333_v57 = vrot.slane %v332_v55, 1 }
  0x52   :  { %v326_v58 = vadd.f32 %v325_v56, %v324_v54 }
  0x53   :  { %v334_v0 = vadd.f32 %v333_v57, %v332_v55 }
  0x6f   :  { %927 = vadd.xlane.f32.xlu0 %v926_v12 }
  0x85   :  { %113 = vperm.xlu0 %2701, %v108_v20  }
  0x9b   :  { %v88_v5 = vpop.permute.xlu1 %87 }
  0x9c   :  { %vm98_vm11 = vcmp.eq.s32.totalorder %v88_v5, %v3039_v8 }
  0x9d   :  { %v102_v10 = vsel %vm98_vm11, 1.0, %v2833_v7  ;;  %vm592_vm11 = vcmp.eq.s32.totalorder %v2982_v14, 4 }
  0x9f   :  { %v91_v6 = vpop.permute.xlu1 %90 }
  0xa0   :  { %vm99_vm12 = vcmp.eq.s32.totalorder %v91_v6, %v3039_v8 }
  0xa1   :  { %v103_v12 = vsel %vm99_vm12, 1.0, %v2833_v7  ;;  %vm601_vm12 = vcmp.eq.s32.totalorder %v2982_v14, 5 }
 0x120   :  { %v2316_v13 = vpop.f32.mrb[0].mxu0 }
 0x121   :  { %v316_v15 = vmax.f32 %v2316_v13, 0.0  ;;  %v306_v11 = vpop.f32.mrb[1].mxu0  ;;  %v3077_v13 = vpack.c.bf16 %v103_v12, %v102_v10 }
 0x122   :  { %v315_v16 = vmax.f32 %v306_v11, 0.0 }
 0x123   :  { %v350_v17 = vsel %vm348_vm9, %v316_v15, 0.0  ;;  %2330 = vmatprep.mubr.msk.bf16.mxu0 %vm475_vm13, %v3077_v13 }
 0x124   :  { %v349_v18 = vsel %vm348_vm9, %v315_v16, 0.0 }
 0x125   :  { %v351_v19 = vadd.f32 %v350_v17, %v349_v18 }
 0x127   :  { %v352_v21 = vrot.slane %v351_v19, 4 }
 0x129   :  { %v353_v22 = vadd.f32 %v352_v21, %v351_v19 }
 0x12b   :  { %v354_v23 = vrot.slane %v353_v22, 2 }
 0x12d   :  { %v355_v24 = vadd.f32 %v354_v23, %v353_v22 }
 0x12f   :  { %v356_v25 = vrot.slane %v355_v24, 1 }
 0x131   :  { %v357_v26 = vadd.f32 %v356_v25, %v355_v24 }
 0x133   :  { %v358_v27 = vmul.f32 0.0625, %v357_v26  ;;  %v3099_v26 = vadd.s32 8, %v2982_v14 }
 0x135   :  { %v359_v28 = vsub.f32 %v315_v16, %v358_v27  ;;  %v360_v29 = vsub.f32 %v316_v15, %v358_v27  ;;  %v3081_v15 = vpop.permute.xlu0 %464  ;;  %v97_v16 = vpop.permute.xlu1 %96 }
 0x136   :  { %vm101_vm15 = vcmp.eq.s32.totalorder %v97_v16, %v3039_v8 }
 0x137   :  { %v361_v30 = vmul.f32 %v359_v28, %v359_v28  ;;  %v362_v31 = vmul.f32 %v360_v29, %v360_v29  ;;  %v105_v24 = vsel %vm101_vm15, 1.0, %v2833_v7  ;;  %vm935_vm15 = vcmp.eq.s32.totalorder %v3039_v8, 1 }
 0x139   :  { %v363_v33 = vsel %vm348_vm9, %v361_v30, 0.0  ;;  %v364_v34 = vsel %vm348_vm9, %v362_v31, 0.0  ;;  %v3083_v11 = vpop.permute.xlu0 %469 }
 0x13a   :  { %v365_v35 = vadd.f32 %v364_v34, %v363_v33 }
 0x13c   :  { %v366_v37 = vrot.slane %v365_v35, 4 }
 0x13d   :  { %v94_v18 = vpop.permute.xlu0 %93 }
 0x13e   :  { %v367_v39 = vadd.f32 %v366_v37, %v365_v35  ;;  %vm100_vm14 = vcmp.eq.s32.totalorder %v94_v18, %v3039_v8 }
 0x13f   :  { %v104_v23 = vsel %vm100_vm14, 1.0, %v2833_v7 }
 0x140   :  { %v368_v41 = vrot.slane %v367_v39, 2  ;;  %v3091_v25 = vpack.c.bf16 %v105_v24, %v104_v23 }
 0x142   :  { %v369_v44 = vadd.f32 %v368_v41, %v367_v39  ;;  %v611_v39 = vld [vmem:[%s3655_s10 + $0x28] sm:$0xff]  ;;  %v612_v41 = vld [vmem:[%s3655_s10 + $0x30] sm:$0xff] }
 0x143   :  { %v2572_v40 = vpack.c.bf16 %v611_v39, %v610_v38  ;;  %v2576_v43 = vpack.c.bf16 %v613_v42, %v612_v41 }
 0x144   :  { %v370_v46 = vrot.slane %v369_v44, 1 }
 0x145   :  { %2573 = vmatprep.subr.bf16.mxu1 %v2572_v40 }
 0x146   :  { %v371_v48 = vadd.f32 %v370_v46, %v369_v44  ;;  %v336_v44 = vsel %vm335_vm5, %v3059_v32, 0.0 }
 0x147   :  { %v337_v45 = vsel %vm319_vm10, %v336_v44, 0.0 }
 0x148   :  { %v372_v50 = vmul.f32 0.0625, %v371_v48  ;;  %v338_v46 = vrot.slane %v337_v45, 4 }
 0x14a   :  { %v373_v52 = vadd.f32 1e-05, %v372_v50  ;;  %v339_v47 = vadd.f32 %v338_v46, %v337_v45 }
 0x14c   :  { %2708 = vrsqrt.f32 %v373_v52  ;;  %v340_v48 = vrot.slane %v339_v47, 2 }
 0x14e   :  { %v341_v49 = vadd.f32 %v340_v48, %v339_v47 }
 0x150   :  { %v342_v50 = vrot.slane %v341_v49, 1 }
 0x152   :  { %v343_v52 = vadd.f32 %v342_v50, %v341_v49 }
 0x156   :  { %v2709_v59 = vpop.eup %2708 }
 0x157   :  { %v375_v62 = vmul.f32 %v2709_v59, %v359_v28  ;;  %v376_v63 = vmul.f32 %v2709_v59, %v360_v29  ;;  %v2156_v28 = vld [vmem:[%s3692_s0] ss:$0 sm:$0xff] }
 0x158   :  { %vm152_vm1 = vcmp.eq.s32.totalorder %v2156_v28, %v2982_v14  ;;  %vm153_vm4 = vcmp.eq.s32.totalorder %v2156_v28, %v3099_v26  ;;  %v584_v28 = vsel %vm583_vm6, %v3059_v32, 0.0  ;;  %vm1197_vm6 = vcmask 523264  }
 0x159   :  { %v377_v1 = vmul.f32 %v375_v62, %v326_v58  ;;  %v378_v2 = vmul.f32 %v376_v63, %v326_v58  ;;  %v154_v35 = vsel %vm152_vm1, 1.0, %v2833_v7  ;;  %v155_v36 = vsel %vm153_vm4, 1.0, %v2833_v7 }
 0x15a   :  { %v3109_v37 = vpack.c.bf16 %v155_v36, %v154_v35  ;;  %vm917_vm1 = vcmask 23552   ;;  %vm944_vm4 = vcmp.eq.s32.totalorder %v3039_v8, 2 }
 0x15b   :  { %v379_v3 = vadd.f32 %v377_v1, %v334_v0  ;;  %v380_v4 = vadd.f32 %v378_v2, %v334_v0 }
 0x15d   :  { %2325 = vmatprep.mubr.msk.f32.mxu1 %vm348_vm9, %v379_v3 }
 0x15e   :  { %2326 = vmatmul.mubr.msk.f32.vlgmr.msra.gmra.mrb[0].mxu1 %vm348_vm9, %v380_v4 }
 0x15f   :  { %2575 = vmatpush3.bf16.msra.mxu1 %v2572_v40 }
 0x160   :  { %2577 = vmatprep.subr.bf16.mxu1 %v2576_v43 }
 0x163   :  { %2579 = vmatpush3.bf16.msra.mxu1 %v2576_v43 }
 0x231   :  { %v2327_v17 = vpop.f32.mrb[0].mxu1 }
 0x232   :  { %v473_v19 = vmul.f32 %v2327_v17, %v3083_v11  ;;  %v453_v20 = vpop.f32.mrb[1].mxu1 }
 0x233   :  { %v472_v21 = vmul.f32 %v3081_v15, %v453_v20 }
 0x235   :  { %v474_v22 = vpack.c.bf16 %v473_v19, %v472_v21 }
 0x237   :  { %2328 = vmatprep.subr.bf16.mxu0 %v474_v22 }
 0x238   :  { %2329 = vmatpush3.bf16.msra.mxu0 %v474_v22 }
 0x239   :  { %2334 = vmatprep.subr.bf16.mxu0 %v2833_v7 }
 0x23b   :  { %2331 = vmatmul.mubr.msk.bf16.vlgmr.msra.gmra.mrb[4].mxu0 %vm475_vm13, %v3091_v25 }
 0x23c   :  { %2338 = vmatprep.mubr.msk.bf16.mxu0 %vm2834_vm0, %v2833_v7 }
 0x30e   :  { %v2332_v27 = vpop.f32.mrb[4].mxu0 }
 0x30f   :  { %v516_v29 = vpop.f32.mrb[5].mxu0 }
 0x310   :  { %v2333_v30 = vpop.f32.mrb[6].mxu0 }
 0x311   :  { %v532_v31 = vpack.c.bf16 %v2333_v30, %v2332_v27  ;;  %v519_v33 = vpop.f32.mrb[7].mxu0  ;;  %v593_v30 = vsel %vm592_vm11, %v3059_v32, 0.0  ;;  %vm1181_vm11 = vcmask 517120  }
 0x312   :  { %v531_v34 = vpack.c.bf16 %v519_v33, %v516_v29  ;;  %v594_v35 = vsel %vm319_vm10, %v593_v30, 0.0 }
 0x313   :  { %v595_v39 = vrot.slane %v594_v35, 4 }
 0x314   :  { %2335 = vmatpush3.bf16.msra.mxu0 %v531_v34 }
 0x315   :  { %2336 = vmatprep.subr.bf16.mxu0 %v2833_v7  ;;  %v596_v43 = vadd.f32 %v595_v39, %v594_v35 }
 0x317   :  { %v597_v47 = vrot.slane %v596_v43, 2 }
 0x318   :  { %2337 = vmatpush3.bf16.msra.mxu0 %v532_v31  ;;  %v585_v31 = vsel %vm319_vm10, %v584_v28, 0.0 }
 0x319   :  { %2359 = vmatprep.subr.bf16.mxu0 %v2833_v7  ;;  %v586_v36 = vrot.slane %v585_v31, 4  ;;  %v598_v49 = vadd.f32 %v597_v47, %v596_v43 }
 0x31b   :  { %2339 = vmatmul.mubr.msk.bf16.vlgmr.msra.gmra.mrb[8].mxu0 %vm348_vm9, %v3109_v37  ;;  %v587_v41 = vadd.f32 %v586_v36, %v585_v31  ;;  %v928_v31 = vpop.xlane.xlu0 %927 }
 0x31c   :  { %2363 = vmatprep.mubr.msk.bf16.mxu0 %vm2834_vm0, %v2833_v7 }
 0x31d   :  { %v588_v45 = vrot.slane %v587_v41, 2 }
 0x31f   :  { %v589_v48 = vadd.f32 %v588_v45, %v587_v41  ;;  %v114_v36 = vpop.permute.xlu0 %113 }
 0x320   :  { %vm124_vm14 = vcmp.eq.s32.totalorder %v114_v36, %v3039_v8 }
 0x321   :  { %v590_v50 = vrot.slane %v589_v48, 1 }
 0x3ee   :  { %v570_v51 = vpop.f32.mrb[8].mxu0 }
 0x3ef   :  { %v571_v53 = vadd.f32 %v570_v51, %v472_v21  ;;  %v2340_v54 = vpop.f32.mrb[9].mxu0  ;;  %v599_v51 = vrot.slane %v598_v49, 1 }
 0x3f0   :  { %v573_v55 = vpop.f32.mrb[10].mxu0 }
 0x3f1   :  { %v577_v56 = vmul.f32 %v571_v53, %v3081_v15  ;;  %v574_v57 = vadd.f32 %v573_v55, %v473_v19  ;;  %v2341_v58 = vpop.f32.mrb[11].mxu0  ;;  %v600_v55 = vadd.f32 %v599_v51, %v598_v49 }
 0x3f3   :  { %v579_v59 = vadd.f32 %v577_v56, %v343_v52  ;;  %v578_v62 = vmul.f32 %v574_v57, %v3083_v11 }
 0x3f5   :  { %v581_v63 = vmax.f32 %v579_v59, 0.0  ;;  %v580_v0 = vadd.f32 %v578_v62, %v343_v52  ;;  %v591_v52 = vadd.f32 %v590_v50, %v589_v48 }
 0x3f7   :  { %v582_v1 = vmax.f32 %v580_v0, 0.0  ;;  %v614_v2 = vsel %vm348_vm9, %v581_v63, 0.0 }
 0x3f9   :  { %v615_v3 = vsel %vm348_vm9, %v582_v1, 0.0 }
 0x3fa   :  { %v616_v4 = vadd.f32 %v615_v3, %v614_v2 }
 0x3fc   :  { %v617_v5 = vrot.slane %v616_v4, 4 }
 0x3fe   :  { %v618_v6 = vadd.f32 %v617_v5, %v616_v4 }
 0x400   :  { %v619_v10 = vrot.slane %v618_v6, 2 }
 0x402   :  { %v620_v12 = vadd.f32 %v619_v10, %v618_v6 }
 0x404   :  { %v621_v16 = vrot.slane %v620_v12, 1 }
 0x406   :  { %v622_v17 = vadd.f32 %v621_v16, %v620_v12 }
 0x408   :  { %v623_v18 = vmul.f32 0.0625, %v622_v17  ;;  %v828_v17 = vld [vmem:[%s3656_s11] sm:$0xff] }
 0x40a   :  { %v624_v19 = vsub.f32 %v581_v63, %v623_v18  ;;  %v625_v20 = vsub.f32 %v582_v1, %v623_v18  ;;  %v829_v18 = vld [vmem:[%s3656_s11 + $0x8] sm:$0xff] }
 0x40c   :  { %v626_v21 = vmul.f32 %v624_v19, %v624_v19  ;;  %v627_v22 = vmul.f32 %v625_v20, %v625_v20 }
 0x40e   :  { %v628_v23 = vsel %vm348_vm9, %v626_v21, 0.0  ;;  %v629_v24 = vsel %vm348_vm9, %v627_v22, 0.0  ;;  %v831_v21 = vld [vmem:[%s3656_s11 + $0x18] sm:$0xff] }
 0x40f   :  { %v630_v27 = vadd.f32 %v629_v24, %v628_v23  ;;  %v602_v23 = vsel %vm601_vm12, %v3059_v32, 0.0 }
 0x410   :  { %v603_v24 = vsel %vm319_vm10, %v602_v23, 0.0 }
 0x411   :  { %v631_v29 = vrot.slane %v630_v27, 4 }
 0x413   :  { %v632_v33 = vadd.f32 %v631_v29, %v630_v27  ;;  %v604_v27 = vrot.slane %v603_v24, 4 }
 0x415   :  { %v633_v34 = vrot.slane %v632_v33, 2  ;;  %v605_v28 = vadd.f32 %v604_v27, %v603_v24 }
 0x417   :  { %v634_v38 = vadd.f32 %v633_v34, %v632_v33  ;;  %v606_v29 = vrot.slane %v605_v28, 2  ;;  %v117_v34 = vpop.permute.xlu1 %116 }
 0x418   :  { %vm125_vm10 = vcmp.eq.s32.totalorder %v117_v34, %v3039_v8 }
 0x419   :  { %v635_v40 = vrot.slane %v634_v38, 1  ;;  %v607_v30 = vadd.f32 %v606_v29, %v605_v28  ;;  %v129_v47 = vsel %vm125_vm10, 1.0, %v2833_v7  ;;  %vm1319_vm10 = vcmp.lt.s32.totalorder %v3039_v8, 32 }
 0x41b   :  { %v636_v42 = vadd.f32 %v635_v40, %v634_v38  ;;  %v608_v33 = vrot.slane %v607_v30, 1 }
 0x41d   :  { %v637_v44 = vmul.f32 0.0625, %v636_v42  ;;  %v609_v38 = vadd.f32 %v608_v33, %v607_v30 }
 0x41f   :  { %v638_v46 = vadd.f32 1e-05, %v637_v44 }
 0x421   :  { %2710 = vrsqrt.f32 %v638_v46  ;;  %v128_v46 = vsel %vm124_vm14, 1.0, %v2833_v7 }
 0x42b   :  { %v2711_v53 = vpop.eup %2710 }
 0x42c   :  { %v641_v54 = vmul.f32 %v2711_v53, %v625_v20  ;;  %v640_v56 = vmul.f32 %v2711_v53, %v624_v19  ;;  %v2580_v19 = vpack.c.bf16 %v829_v18, %v828_v17  ;;  %v830_v20 = vld [vmem:[%s3656_s11 + $0x10] sm:$0xff] }
 0x42d   :  { %v2584_v22 = vpack.c.bf16 %v831_v21, %v830_v20 }
 0x42e   :  { %v643_v57 = vmul.f32 %v641_v54, %v591_v52  ;;  %v642_v58 = vmul.f32 %v640_v56, %v591_v52 }
 0x430   :  { %v644_v59 = vadd.f32 %v642_v58, %v600_v55  ;;  %v645_v62 = vadd.f32 %v643_v57, %v600_v55 }
 0x432   :  { %2350 = vmatprep.mubr.msk.f32.mxu1 %vm348_vm9, %v644_v59 }
 0x433   :  { %2351 = vmatmul.mubr.msk.f32.vlgmr.msra.gmra.mrb[2].mxu1 %vm348_vm9, %v645_v62  ;;  %v110_v62 = vld [vmem:[%s3690_s30 + $0x10] sm:$0xff] }
 0x434   :  { %2355 = vmatprep.mubr.msk.bf16.mxu1 %vm475_vm13, %v3077_v13 }
 0x506   :  { %v2352_v63 = vpop.f32.mrb[2].mxu1 }
 0x507   :  { %v728_v0 = vmul.f32 %v2352_v63, %v3083_v11  ;;  %v718_v1 = vpop.f32.mrb[3].mxu1  ;;  %v111_v63 = vld [vmem:[%s3690_s30 + $0x18] sm:$0xff]  ;;  %s2835_s30 = smov 32  }
 0x508   :  { %v727_v2 = vmul.f32 %v718_v1, %v3081_v15 }
 0x50a   :  { %v729_v3 = vpack.c.bf16 %v728_v0, %v727_v2 }
 0x50c   :  { %2353 = vmatprep.subr.bf16.mxu1 %v729_v3 }
 0x50d   :  { %2354 = vmatpush3.bf16.msra.mxu1 %v729_v3 }
 0x50e   :  { %2581 = vmatprep.subr.bf16.mxu1 %v2580_v19 }
 0x510   :  { %2356 = vmatmul.mubr.msk.bf16.vlgmr.msra.gmra.mrb[4].mxu1 %vm475_vm13, %v3091_v25 }
 0x511   :  { %2583 = vmatpush3.bf16.msra.mxu1 %v2580_v19 }
 0x512   :  { %2585 = vmatprep.subr.bf16.mxu1 %v2584_v22 }
 0x515   :  { %2587 = vmatpush3.bf16.msra.mxu1 %v2584_v22 }
 0x5e3   :  { %v2357_v4 = vpop.f32.mrb[4].mxu1 }
 0x5e4   :  { %v764_v5 = vpop.f32.mrb[5].mxu1 }
 0x5e5   :  { %v2358_v6 = vpop.f32.mrb[6].mxu1 }
 0x5e6   :  { %v780_v10 = vpack.c.bf16 %v2358_v6, %v2357_v4  ;;  %v767_v12 = vpop.f32.mrb[7].mxu1  ;;  %v931_v6 = vsub.s32 0, %v2982_v14 }
 0x5e7   :  { %v779_v16 = vpack.c.bf16 %v767_v12, %v764_v5 }
 0x5e9   :  { %2360 = vmatpush3.bf16.msra.mxu0 %v779_v16  ;;  %v932_v16 = vrot.slane %v928_v31, %v931_v6 }
 0x5ea   :  { %2361 = vmatprep.subr.bf16.mxu0 %v2833_v7 }
 0x5ed   :  { %2362 = vmatpush3.bf16.msra.mxu0 %v780_v10 }
 0x5f0   :  { %2364 = vmatmul.mubr.msk.bf16.vlgmr.msra.gmra.mrb[12].mxu0 %vm348_vm9, %v3109_v37 }
 0x5f1   :  { %2386 = vmatprep.mubr.msk.bf16.mxu0 %vm475_vm13, %v3077_v13 }
 0x6c3   :  { %v815_v35 = vpop.f32.mrb[12].mxu0 }
 0x6c4   :  { %v816_v39 = vadd.f32 %v815_v35, %v727_v2  ;;  %v2365_v40 = vpop.f32.mrb[13].mxu0 }
 0x6c5   :  { %v818_v41 = vpop.f32.mrb[14].mxu0 }
 0x6c6   :  { %v822_v42 = vmul.f32 %v816_v39, %v3081_v15  ;;  %v819_v43 = vadd.f32 %v818_v41, %v728_v0  ;;  %v2366_v44 = vpop.f32.mrb[15].mxu0  ;;  %v132_v15 = vpack.c.bf16 %v129_v47, %v128_v46  ;;  %v953_v0 = vsel %vm935_vm15, %v3044_v9, 0.0 }
 0x6c7   :  { %v954_v2 = vsel %vm925_vm8, %v953_v0, 0.0 }
 0x6c8   :  { %v824_v32 = vadd.f32 %v822_v42, %v609_v38  ;;  %v823_v45 = vmul.f32 %v819_v43, %v3083_v11 }
 0x6ca   :  { %v3179_v48 = vmax.f32 %v824_v32, 0.0  ;;  %v825_v49 = vadd.f32 %v823_v45, %v609_v38 }
 0x6cc   :  { %v3181_v50 = vmax.f32 %v825_v49, 0.0  ;;  %2375 = vmatprep.mubr.msk.f32.mxu1 %vm348_vm9, %v3179_v48 }
 0x6ce   :  { %2376 = vmatmul.mubr.msk.f32.vlgmr.msra.gmra.mrb[8].mxu1 %vm348_vm9, %v3181_v50 }
 0x6cf   :  { %2380 = vmatprep.mubr.msk.bf16.mxu1 %vm475_vm13, %v132_v15 }
 0x7a1   :  { %v2377_v11 = vpop.f32.mrb[8].mxu1 }
 0x7a2   :  { %v904_v51 = vpop.f32.mrb[9].mxu1  ;;  %v937_v52 = vsel %vm935_vm15, %v2377_v11, 0.0  ;;  %v916_v53 = vsel %vm914_vm7, %v2377_v11, 0.0  ;;  %v946_v4 = vsel %vm944_vm4, %v2377_v11, 0.0 }
 0x7a3   :  { %v941_v54 = vsel %vm917_vm1, %v937_v52, 0.0  ;;  %v921_v55 = vsel %vm917_vm1, %v916_v53, 0.0  ;;  %v936_v56 = vsel %vm935_vm15, %v904_v51, 0.0  ;;  %v915_v57 = vsel %vm914_vm7, %v904_v51, 0.0 }
 0x7a4   :  { %942 = vadd.xlane.f32.xlu1 %v941_v54  ;;  %922 = vadd.xlane.f32.xlu0 %v921_v55  ;;  %v938_v58 = vsel %vm917_vm1, %v936_v56, 0.0  ;;  %v918_v59 = vsel %vm917_vm1, %v915_v57, 0.0  ;;  %v945_v1 = vsel %vm944_vm4, %v904_v51, 0.0  ;;  %v950_v5 = vsel %vm917_vm1, %v946_v4, 0.0 }
 0x7a5   :  { %v947_v3 = vsel %vm917_vm1, %v945_v1, 0.0  ;;  %vm1684_vm15 = vcmask 785408  }
 0x7a8   :  { %939 = vadd.xlane.f32.xlu0 %v938_v58  ;;  %919 = vadd.xlane.f32.xlu1 %v918_v59 }
 0x7b9   :  { %119 = vperm.xlu1 %2700, %v110_v62  }
 0x7be   :  { %122 = vperm.xlu0 %2701, %v111_v63  }
 0x7dd   :  { %948 = vadd.xlane.f32.xlu0 %v947_v3  ;;  %955 = vadd.xlane.f32.xlu1 %v954_v2 }
 0x7e1   :  { %951 = vadd.xlane.f32.xlu0 %v950_v5 }
 0x831   :  { %v923_v10 = vpop.xlane.xlu0 %922  ;;  %v943_v12 = vpop.xlane.xlu1 %942 }
 0x832   :  { %v934_v19 = vadd.f32 %v932_v16, %v923_v10 }
 0x835   :  { %v940_v17 = vpop.xlane.xlu0 %939  ;;  %v920_v18 = vpop.xlane.xlu1 %919 }
 0x836   :  { %v964_v9 = vpack.c.bf16 %v943_v12, %v940_v17  ;;  %v933_v20 = vadd.f32 %v932_v16, %v920_v18 }
 0x838   :  { %v963_v21 = vpack.c.bf16 %v934_v19, %v933_v20  ;;  %2378 = vmatprep.subr.bf16.mxu1 %v964_v9 }
 0x839   :  { %2379 = vmatpush3.bf16.msra.mxu1 %v964_v9  ;;  %v120_v22 = vpop.permute.xlu1 %119 }
 0x83a   :  { %2384 = vmatprep.subr.bf16.mxu0 %v963_v21  ;;  %2390 = vmatprep.subr.bf16.mxu1 %v2833_v7  ;;  %vm126_vm7 = vcmp.eq.s32.totalorder %v120_v22, %v3039_v8 }
 0x83b   :  { %2385 = vmatpush3.bf16.msra.mxu0 %v963_v21  ;;  %v130_v24 = vsel %vm126_vm7, 1.0, %v2833_v7 }
 0x83d   :  { %v123_v23 = vpop.permute.xlu0 %122 }
 0x83e   :  { %vm127_vm8 = vcmp.eq.s32.totalorder %v123_v23, %v3039_v8  ;;  %2387 = vmatmul.mubr.msk.bf16.vlgmr.msra.gmra.mrb[16].mxu0 %vm475_vm13, %v3091_v25  ;;  %v1179_v23 = vld [vmem:[%s3658_s13] sm:$0x3]  ;;  %v1543_v8 = vld [vmem:[%s3661_s16 + $0x8] sm:$0xff] }
 0x83f   :  { %v131_v27 = vsel %vm127_vm8, 1.0, %v2833_v7  ;;  %2419 = vmatprep.mubr.msk.bf16.mxu0 %vm475_vm13, %v3077_v13 }
 0x840   :  { %v133_v28 = vpack.c.bf16 %v131_v27, %v130_v24 }
 0x842   :  { %2381 = vmatmul.mubr.msk.bf16.vlgmr.msra.gmra.mrb[12].mxu1 %vm475_vm13, %v133_v28 }
 0x843   :  { %2394 = vmatprep.mubr.msk.bf16.mxu1 %vm2834_vm0, %v2833_v7 }
 0x86a   :  { %v949_v29 = vpop.xlane.xlu0 %948  ;;  %v956_v30 = vpop.xlane.xlu1 %955 }
 0x86b   :  { %v960_v31 = vrot.slane %v956_v30, %v931_v6 }
 0x86d   :  { %v961_v33 = vadd.f32 %v960_v31, %v949_v29 }
 0x86e   :  { %v952_v34 = vpop.xlane.xlu0 %951 }
 0x86f   :  { %v1097_v35 = vsub.f32 0.0, %v961_v33  ;;  %v962_v36 = vadd.f32 %v960_v31, %v952_v34 }
 0x871   :  { %v1099_v38 = vmul.f32 1.442695, %v1097_v35  ;;  %v1098_v39 = vsub.f32 0.0, %v962_v36 }
 0x873   :  { %2712 = vpow2.f32 %v1099_v38  ;;  %v1101_v40 = vmul.f32 1.442695, %v1098_v39  ;;  %v1180_v38 = vsel %vm176_vm2, %v1179_v23, 0.0 }
 0x875   :  { %2714 = vpow2.f32 %v1101_v40 }
 0x87d   :  { %v2713_v41 = vpop.eup %2712 }
 0x87e   :  { %v1103_v13 = vadd.f32 1.0, %v2713_v41 }
 0x87f   :  { %v2715_v42 = vpop.eup %2714 }
 0x880   :  { %2716 = vrcp.f32 %v1103_v13  ;;  %v1104_v43 = vadd.f32 1.0, %v2715_v42  ;;  %v1182_v13 = vsel %vm1181_vm11, %v1180_v38, 0.0  ;;  %v1189_v42 = vsel %vm186_vm3, %v1179_v23, 0.0  ;;  %v1236_v38 = vld [vmem:[%s3659_s14 + $0x30] sm:$0xff] }
 0x882   :  { %2718 = vrcp.f32 %v1104_v43 }
 0x88a   :  { %v2717_v44 = vpop.eup %2716 }
 0x88b   :  { %v1109_v32 = vsub.f32 1.0, %v2717_v44  ;;  %v1165_v15 = vmul.f32 %v2717_v44, %v3179_v48  ;;  %v1183_v44 = vrot.slane %v1182_v13, 4 }
 0x88c   :  { %v2719_v45 = vpop.eup %2718 }
 0x88d   :  { %v1167_v46 = vmul.f32 %v1109_v32, %v3179_v48  ;;  %v1110_v47 = vsub.f32 1.0, %v2719_v45  ;;  %v1166_v52 = vmul.f32 %v2719_v45, %v3181_v50  ;;  %v1190_v45 = vsel %vm1181_vm11, %v1189_v42, 0.0 }
 0x88e   :  { %v1157_v42 = vadd.f32 1.0, %v3012_v60 }
 0x88f   :  { %1171 = vrot.lane.b32.xlu1 %v1167_v46, %s2835_s30  ;;  %v1168_v49 = vmul.f32 %v1110_v47, %v3181_v50 }
 0x891   :  { %1173 = vrot.lane.b32.xlu0 %v1168_v49, %s2835_s30 }
 0x901   :  { %v1172_v11 = vpop.permute.xlu1 %1171 }
 0x902   :  { %v1177_v51 = vsel %vm348_vm9, %v1165_v15, %v1172_v11  ;;  %v1184_v15 = vadd.f32 %v1183_v44, %v1182_v13  ;;  %v1191_v11 = vrot.slane %v1190_v45, 4 }
 0x903   :  { %v1174_v53 = vpop.permute.xlu0 %1173  ;;  %v1198_v55 = vsel %vm1197_vm6, %v1177_v51, 0.0 }
 0x904   :  { %v1178_v54 = vsel %vm348_vm9, %v1166_v52, %v1174_v53 }
 0x905   :  { %v1199_v56 = vsel %vm1197_vm6, %v1178_v54, 0.0 }
 0x906   :  { %v1200_v57 = vadd.f32 %v1199_v56, %v1198_v55 }
 0x908   :  { %v1201_v58 = vrot.slane %v1200_v57, 4 }
 0x90a   :  { %v1202_v59 = vadd.f32 %v1201_v58, %v1200_v57  ;;  %v1185_v58 = vrot.slane %v1184_v15, 2 }
 0x90c   :  { %v1203_v62 = vrot.slane %v1202_v59, 2 }
 0x90e   :  { %v1204_v63 = vadd.f32 %v1203_v62, %v1202_v59  ;;  %v1192_v59 = vadd.f32 %v1191_v11, %v1190_v45 }
 0x910   :  { %v1205_v0 = vrot.slane %v1204_v63, 1 }
 0x911   :  { %v2388_v48 = vpop.f32.mrb[16].mxu0 }
 0x912   :  { %v1206_v1 = vadd.f32 %v1205_v0, %v1204_v63  ;;  %v1054_v2 = vpop.f32.mrb[17].mxu0  ;;  %v1186_v0 = vadd.f32 %v1185_v58, %v1184_v15 }
 0x913   :  { %v2389_v3 = vpop.f32.mrb[18].mxu0 }
 0x914   :  { %v1207_v4 = vmul.f32 0.0625, %v1206_v1  ;;  %v1057_v5 = vpop.f32.mrb[19].mxu0  ;;  %v1187_v1 = vrot.slane %v1186_v0, 1 }
 0x915   :  { %v2382_v50 = vpop.f32.mrb[12].mxu1 }
 0x916   :  { %v3235_v6 = vsub.f32 %v1177_v51, %v1207_v4  ;;  %v3237_v10 = vsub.f32 %v1178_v54, %v1207_v4  ;;  %v1063_v12 = vadd.f32 %v2388_v48, %v2382_v50  ;;  %v1005_v16 = vpop.f32.mrb[13].mxu1  ;;  %v1193_v48 = vrot.slane %v1192_v59, 2 }
 0x917   :  { %v1055_v17 = vadd.f32 %v1054_v2, %v1005_v16  ;;  %v2383_v18 = vpop.f32.mrb[14].mxu1 }
 0x918   :  { %v1210_v19 = vmul.f32 %v3235_v6, %v3235_v6  ;;  %v1211_v9 = vmul.f32 %v3237_v10, %v3237_v10  ;;  %v1071_v20 = vsub.f32 0.0, %v1063_v12  ;;  %v1066_v21 = vadd.f32 %v2389_v3, %v2383_v18  ;;  %v1008_v22 = vpop.f32.mrb[15].mxu1  ;;  %v2155_v3 = vld [vmem:[%s3693_s1] ss:$0 sm:$0xff] }
 0x919   :  { %v1069_v24 = vsub.f32 0.0, %v1055_v17  ;;  %v1058_v27 = vadd.f32 %v1057_v5, %v1008_v22  ;;  %v1194_v2 = vadd.f32 %v1193_v48, %v1192_v59  ;;  %vm142_vm12 = vcmp.eq.s32.totalorder %v2155_v3, %v2982_v14  ;;  %v1230_v18 = vld [vmem:[%s3659_s14] sm:$0xff] }
 0x91a   :  { %v1212_v28 = vsel %vm1197_vm6, %v1210_v19, 0.0  ;;  %v1213_v29 = vsel %vm1197_vm6, %v1211_v9, 0.0  ;;  %v1077_v30 = vmul.f32 1.442695, %v1071_v20  ;;  %v1072_v31 = vsub.f32 0.0, %v1066_v21  ;;  %v1231_v19 = vld [vmem:[%s3659_s14 + $0x8] sm:$0xff] }
 0x91b   :  { %v1214_v33 = vadd.f32 %v1213_v29, %v1212_v28  ;;  %v1073_v34 = vmul.f32 1.442695, %v1069_v24  ;;  %v1070_v35 = vsub.f32 0.0, %v1058_v27  ;;  %vm143_vm14 = vcmp.eq.s32.totalorder %v2155_v3, %v3099_v26 }
 0x91c   :  { %2720 = vpow2.f32 %v1077_v30  ;;  %v1079_v36 = vmul.f32 1.442695, %v1072_v31  ;;  %v1188_v12 = vadd.f32 %v1187_v1, %v1186_v0  ;;  %v1195_v16 = vrot.slane %v1194_v2, 1 }
 0x91d   :  { %v1215_v39 = vrot.slane %v1214_v33, 4  ;;  %2722 = vpow2.f32 %v1073_v34  ;;  %v1075_v40 = vmul.f32 1.442695, %v1070_v35  ;;  %v144_v21 = vsel %vm142_vm12, 1.0, %v2833_v7  ;;  %v1234_v34 = vld [vmem:[%s3659_s14 + $0x20] sm:$0xff]  ;;  %v1235_v35 = vld [vmem:[%s3659_s14 + $0x28] sm:$0xff] }
 0x91e   :  { %2724 = vpow2.f32 %v1079_v36  ;;  %v145_v22 = vsel %vm143_vm14, 1.0, %v2833_v7  ;;  %v2588_v24 = vpack.c.bf16 %v1231_v19, %v1230_v18  ;;  %v1196_v27 = vadd.f32 %v1195_v16, %v1194_v2 }
 0x91f   :  { %v1216_v41 = vadd.f32 %v1215_v39, %v1214_v33  ;;  %2726 = vpow2.f32 %v1075_v40  ;;  %v146_v30 = vpack.c.bf16 %v145_v22, %v144_v21  ;;  %v2596_v36 = vpack.c.bf16 %v1235_v35, %v1234_v34  ;;  %v1237_v39 = vld [vmem:[%s3659_s14 + $0x38] sm:$0xff]  ;;  %v1544_v34 = vld [vmem:[%s3661_s16 + $0x10] sm:$0xff] }
 0x920   :  { %v2600_v40 = vpack.c.bf16 %v1237_v39, %v1236_v38  ;;  %v2836_v35 = vmov 0.0|0.0   ;;  %v1546_v39 = vld [vmem:[%s3661_s16 + $0x20] sm:$0xff] }
 0x921   :  { %v1217_v43 = vrot.slane %v1216_v41, 2 }
 0x923   :  { %v1218_v32 = vadd.f32 %v1217_v43, %v1216_v41 }
 0x925   :  { %v1219_v46 = vrot.slane %v1218_v32, 1 }
 0x926   :  { %v2721_v47 = vpop.eup %2720 }
 0x927   :  { %v2723_v49 = vpop.eup %2722  ;;  %v1220_v51 = vadd.f32 %v1219_v46, %v1218_v32  ;;  %v1083_v63 = vadd.f32 1.0, %v2721_v47 }
 0x928   :  { %v2725_v52 = vpop.eup %2724  ;;  %v1081_v53 = vadd.f32 1.0, %v2723_v49  ;;  %v1158_v49 = vadd.f32 1.0, %v3017_v61 }
 0x929   :  { %v2727_v54 = vpop.eup %2726  ;;  %v1221_v55 = vmul.f32 0.0625, %v1220_v51  ;;  %v1084_v56 = vadd.f32 1.0, %v2725_v52 }
 0x92a   :  { %v1082_v57 = vadd.f32 1.0, %v2727_v54  ;;  %2728 = vrcp.f32 %v1081_v53 }
 0x92b   :  { %v1222_v62 = vadd.f32 1e-05, %v1221_v55 }
 0x92c   :  { %2730 = vrcp.f32 %v1082_v57 }
 0x92d   :  { %2732 = vrsqrt.f32 %v1222_v62 }
 0x92e   :  { %2734 = vrcp.f32 %v1084_v56 }
 0x92f   :  { %2736 = vrcp.f32 %v1083_v63 }
 0x934   :  { %v3255_v4 = vpop.eup %2728 }
 0x935   :  { %v1093_v56 = vsub.f32 1.0, %v3255_v4 }
 0x936   :  { %v3257_v5 = vpop.eup %2730 }
 0x937   :  { %v2733_v50 = vpop.eup %2732  ;;  %v1111_v17 = vpack.c.bf16 %v3257_v5, %v3255_v4  ;;  %v1094_v61 = vsub.f32 1.0, %v3257_v5 }
 0x938   :  { %v3269_v9 = vpop.eup %2734  ;;  %v1224_v20 = vmul.f32 %v2733_v50, %v3235_v6  ;;  %v1225_v26 = vmul.f32 %v2733_v50, %v3237_v10  ;;  %v1232_v6 = vld [vmem:[%s3659_s14 + $0x10] sm:$0xff]  ;;  %v1233_v10 = vld [vmem:[%s3659_s14 + $0x18] sm:$0xff] }
 0x939   :  { %2391 = vmatpush3.bf16.msra.mxu1 %v1111_v17  ;;  %v3275_v23 = vpop.eup %2736  ;;  %v2592_v31 = vpack.c.bf16 %v1233_v10, %v1232_v6  ;;  %v1096_v58 = vsub.f32 1.0, %v3269_v9 }
 0x93a   :  { %2392 = vmatprep.subr.bf16.mxu1 %v2833_v7  ;;  %v1112_v28 = vpack.c.bf16 %v3269_v9, %v3275_v23  ;;  %v1226_v29 = vmul.f32 %v1224_v20, %v1188_v12  ;;  %v1227_v41 = vmul.f32 %v1225_v26, %v1188_v12  ;;  %v1095_v57 = vsub.f32 1.0, %v3275_v23 }
 0x93c   :  { %v1228_v33 = vadd.f32 %v1226_v29, %v1196_v27  ;;  %v1229_v13 = vadd.f32 %v1227_v41, %v1196_v27 }
 0x93d   :  { %2393 = vmatpush3.bf16.msra.mxu1 %v1112_v28 }
 0x93e   :  { %2589 = vmatprep.subr.bf16.mxu1 %v2588_v24 }
 0x940   :  { %2395 = vmatmul.mubr.msk.bf16.vlgmr.msra.gmra.mrb[16].mxu1 %vm348_vm9, %v146_v30 }
 0x941   :  { %2591 = vmatpush3.bf16.msra.mxu1 %v2588_v24  ;;  %2414 = vmatprep.mubr.msk.f32.mxu1 %vm1197_vm6, %v1228_v33  ;;  %v1542_v33 = vld [vmem:[%s3661_s16] sm:$0xff] }
 0x942   :  { %2593 = vmatprep.subr.bf16.mxu1 %v2592_v31 }
 0x945   :  { %2595 = vmatpush3.bf16.msra.mxu1 %v2592_v31 }
 0x946   :  { %2597 = vmatprep.subr.bf16.mxu1 %v2596_v36 }
 0x949   :  { %2599 = vmatpush3.bf16.msra.mxu1 %v2596_v36  ;;  %v2605_v36 = vpack.c.bf16 %v1543_v8, %v1542_v33  ;;  %v1623_v8 = vld [vmem:[%s3662_s17] sm:$0x3] }
 0x94a   :  { %2601 = vmatprep.subr.bf16.mxu1 %v2600_v40 }
 0x94d   :  { %2603 = vmatpush3.bf16.msra.mxu1 %v2600_v40  ;;  %v1547_v40 = vld [vmem:[%s3661_s16 + $0x28] sm:$0xff] }
 0x94e   :  { %2431 = vmatprep.subr.bf16.mxu1 %v2833_v7  ;;  %v2611_v41 = vpack.c.bf16 %v1547_v40, %v1546_v39  ;;  %v1633_v39 = vsel %vm186_vm3, %v1623_v8, 0.0 }
 0x950   :  { %2415 = vmatmul.mubr.msk.f32.vlgmr.msra.gmra.mrb[10].mxu1 %vm1197_vm6, %v1229_v13  ;;  %v1548_v13 = vld [vmem:[%s3661_s16 + $0x30] sm:$0xff] }
 0x951   :  { %2433 = vmatprep.mubr.msk.bf16.mxu1 %vm2834_vm0, %v2833_v7 }
 0xa13   :  { %v1150_v43 = vpop.f32.mrb[16].mxu1 }
 0xa14   :  { %v1151_v44 = vadd.f32 1.0, %v1150_v43  ;;  %v2396_v32 = vpop.f32.mrb[17].mxu1 }
 0xa15   :  { %v1153_v45 = vpop.f32.mrb[18].mxu1 }
 0xa16   :  { %v1159_v46 = vsub.f32 %v1157_v42, %v1151_v44  ;;  %2738 = vrsqrt.f32 %v1151_v44  ;;  %v1154_v47 = vadd.f32 1.0, %v1153_v45  ;;  %v2397_v15 = vpop.f32.mrb[19].mxu1  ;;  %v1549_v42 = vld [vmem:[%s3661_s16 + $0x38] sm:$0xff] }
 0xa17   :  { %v2614_v43 = vpack.c.bf16 %v1549_v42, %v1548_v13 }
 0xa18   :  { %2740 = vrsqrt.f32 %v1159_v46  ;;  %v1160_v11 = vsub.f32 %v1158_v49, %v1154_v47  ;;  %v2183_v46 = vld [vmem:[%s3660_s15] ss:$0 sm:$0xff] }
 0xa19   :  { %2742 = vrsqrt.f32 %v1154_v47 }
 0xa1a   :  { %2744 = vrsqrt.f32 %v1160_v11 }
 0xa20   :  { %v2739_v51 = vpop.eup %2738 }
 0xa21   :  { %1322 = vperm.xlu1 %2700, %v2739_v51   ;;  %v2157_v51 = vld [vmem:[%s3694_s3] ss:$0 sm:$0xff] }
 0xa22   :  { %v2741_v52 = vpop.eup %2740 }
 0xa23   :  { %1332 = vperm.xlu0 %2701, %v2741_v52   ;;  %v2416_v53 = vpop.f32.mrb[10].mxu1  ;;  %v2743_v60 = vpop.eup %2742 }
 0xa24   :  { %v1310_v54 = vpop.f32.mrb[11].mxu1  ;;  %v2745_v55 = vpop.eup %2744 }
 0xa25   :  { %1327 = vperm.xlu1 %2700, %v2743_v60  }
 0xa27   :  { %1396 = vperm.xlu0 %2701, %v3255_v4  }
 0xa29   :  { %1337 = vperm.xlu1 %2700, %v2745_v55  }
 0xa2b   :  { %1416 = vperm.xlu0 %2701, %v1093_v56  }
 0xa2d   :  { %1401 = vperm.xlu1 %2700, %v3257_v5  }
 0xa2f   :  { %1406 = vperm.xlu0 %2701, %v3275_v23  }
 0xa31   :  { %1421 = vperm.xlu1 %2700, %v1094_v61  }
 0xa33   :  { %1426 = vperm.xlu0 %2701, %v1095_v57  }
 0xa35   :  { %1411 = vperm.xlu1 %2700, %v3269_v9  }
 0xa39   :  { %1431 = vperm.xlu1 %2700, %v1096_v58  }
 0xaa0   :  { %v1323_v59 = vpop.permute.xlu1 %1322 }
 0xaa2   :  { %v1333_v62 = vpop.permute.xlu0 %1332 }
 0xaa3   :  { %v3317_v0 = vsel %vm1319_vm10, %v1323_v59, %v1333_v62 }
 0xaa4   :  { %v1328_v63 = vpop.permute.xlu1 %1327  ;;  %v1342_v2 = vmul.f32 %v3317_v0, %v1310_v54 }
 0xaa6   :  { %v1397_v5 = vpop.permute.xlu0 %1396 }
 0xaa8   :  { %v1338_v48 = vpop.permute.xlu1 %1337 }
 0xaa9   :  { %v3321_v1 = vsel %vm1319_vm10, %v1328_v63, %v1338_v48  ;;  %v1666_v48 = vld [vmem:[%s3663_s18 + $0x8] sm:$0xff] }
 0xaaa   :  { %v1343_v3 = vmul.f32 %v2416_v53, %v3321_v1  ;;  %v1417_v12 = vpop.permute.xlu0 %1416 }
 0xaac   :  { %v1344_v4 = vpack.c.bf16 %v1343_v3, %v1342_v2  ;;  %v1402_v50 = vpop.permute.xlu1 %1401 }
 0xaae   :  { %2417 = vmatprep.subr.bf16.mxu0 %v1344_v4  ;;  %v1407_v17 = vpop.permute.xlu0 %1406 }
 0xaaf   :  { %2418 = vmatpush3.bf16.msra.mxu0 %v1344_v4 }
 0xab0   :  { %2423 = vmatprep.subr.bf16.mxu0 %v2833_v7  ;;  %v1422_v16 = vpop.permute.xlu1 %1421 }
 0xab1   :  { %v1435_v6 = vsel %vm1319_vm10, %v1402_v50, %v1422_v16  ;;  %v1670_v50 = vld [vmem:[%s3663_s18 + $0x28] sm:$0xff]  ;;  %v1671_v16 = vld [vmem:[%s3663_s18 + $0x30] sm:$0xff] }
 0xab2   :  { %2420 = vmatmul.mubr.msk.bf16.vlgmr.msra.gmra.mrb[20].mxu0 %vm475_vm13, %v3091_v25  ;;  %v1427_v19 = vpop.permute.xlu0 %1426  ;;  %v1434_v25 = vsel %vm1319_vm10, %v1397_v5, %v1417_v12  ;;  %v1669_v5 = vld [vmem:[%s3663_s18 + $0x20] sm:$0xff] }
 0xab3   :  { %2427 = vmatprep.mubr.msk.bf16.mxu0 %vm2834_vm0, %v2833_v7  ;;  %v1436_v26 = vsel %vm1319_vm10, %v1407_v17, %v1427_v19  ;;  %v2623_v12 = vpack.c.bf16 %v1670_v50, %v1669_v5  ;;  %v1672_v17 = vld [vmem:[%s3663_s18 + $0x38] sm:$0xff]  ;;  %v1673_v19 = vld [vmem:[%s3663_s18 + $0x40] sm:$0xff] }
 0xab4   :  { %v1412_v18 = vpop.permute.xlu1 %1411  ;;  %v1803_v5 = vld [vmem:[%s3666_s21 + $0x18] sm:$0xff] }
 0xab8   :  { %v1432_v9 = vpop.permute.xlu1 %1431 }
 0xab9   :  { %v1437_v27 = vsel %vm1319_vm10, %v1412_v18, %v1432_v9  ;;  %v2626_v18 = vpack.c.bf16 %v1672_v17, %v1671_v16  ;;  %v1674_v9 = vld [vmem:[%s3663_s18 + $0x48] sm:$0xff]  ;;  %v1911_v16 = vld [vmem:[%s3666_s21 + $0x78] sm:$0xff] }
 0xb85   :  { %v2421_v20 = vpop.f32.mrb[20].mxu0 }
 0xb86   :  { %v1440_v21 = vmul.f32 %v2421_v20, %v1436_v26  ;;  %v1379_v22 = vpop.f32.mrb[21].mxu0  ;;  %v2629_v20 = vpack.c.bf16 %v1674_v9, %v1673_v19  ;;  %v1675_v26 = vld [vmem:[%s3663_s18 + $0x50] sm:$0xff]  ;;  %v1805_v19 = vld [vmem:[%s3666_s21 + $0x28] sm:$0xff] }
 0xb87   :  { %v1438_v23 = vmul.f32 %v1434_v25, %v1379_v22  ;;  %v2422_v24 = vpop.f32.mrb[22].mxu0 }
 0xb88   :  { %v1441_v28 = vmul.f32 %v2422_v24, %v1437_v27  ;;  %v1382_v29 = vpop.f32.mrb[23].mxu0 }
 0xb89   :  { %v1439_v10 = vmul.f32 %v1435_v6, %v1382_v29 }
 0xb8a   :  { %v1443_v30 = vpack.c.bf16 %v1441_v28, %v1440_v21  ;;  %v1676_v21 = vld [vmem:[%s3663_s18 + $0x58] sm:$0xff] }
 0xb8b   :  { %v1442_v31 = vpack.c.bf16 %v1439_v10, %v1438_v23  ;;  %v2632_v22 = vpack.c.bf16 %v1676_v21, %v1675_v26  ;;  %v1913_v26 = vld [vmem:[%s3666_s21 + $0x88] sm:$0xff] }
 0xb8d   :  { %2424 = vmatpush3.bf16.msra.mxu0 %v1442_v31 }
 0xb8e   :  { %2425 = vmatprep.subr.bf16.mxu0 %v2833_v7 }
 0xb91   :  { %2426 = vmatpush3.bf16.msra.mxu0 %v1443_v30 }
 0xb92   :  { %2604 = vmatprep.subr.bf16.mxu0 %v2836_v35 }
 0xb94   :  { %2428 = vmatmul.mubr.msk.bf16.vlgmr.msra.gmra.mrb[24].mxu0 %vm348_vm9, %v3109_v37  ;;  %v1545_v37 = vld [vmem:[%s3661_s16 + $0x18] sm:$0xff]  ;;  %vm162_vm9 = vcmp.eq.s32.totalorder %v2157_v51, %v2982_v14 }
 0xb95   :  { %2453 = vmatprep.mubr.msk.f32.mxu0 %vm2834_vm0, %v2833_v7  ;;  %2606 = vmatpush3.bf16.msra.mxu0 %v2605_v36  ;;  %v2608_v38 = vpack.c.bf16 %v1545_v37, %v1544_v34  ;;  %v163_v56 = vsel %vm162_vm9, 1.0, %v2833_v7  ;;  %v1624_v36 = vsel %vm176_vm2, %v1623_v8, 0.0  ;;  %v1810_v8 = vld [vmem:[%s3666_s21 + $0x50] sm:$0xff] }
 0xb96   :  { %2607 = vmatprep.subr.bf16.mxu0 %v2836_v35  ;;  %v164_v57 = vpack.c.bf16 %v163_v56, %v163_v56 }
 0xb99   :  { %2609 = vmatpush3.bf16.msra.mxu0 %v2608_v38 }
 0xb9a   :  { %2610 = vmatprep.subr.bf16.mxu0 %v2836_v35 }
 0xb9d   :  { %2612 = vmatpush3.bf16.msra.mxu0 %v2611_v41 }
 0xb9e   :  { %2613 = vmatprep.subr.bf16.mxu0 %v2836_v35 }
 0xba1   :  { %2615 = vmatpush3.bf16.msra.mxu0 %v2614_v43 }
 0xba2   :  { %2634 = vmatprep.subr.bf16.mxu0 %v2836_v35 }
 0xc67   :  { %v1478_v44 = vpop.f32.mrb[24].mxu0 }
 0xc68   :  { %v1479_v32 = vadd.f32 %v1478_v44, %v1342_v2  ;;  %v2429_v45 = vpop.f32.mrb[25].mxu0  ;;  %v1667_v2 = vld [vmem:[%s3663_s18 + $0x10] sm:$0xff] }
 0xc69   :  { %v1481_v47 = vpop.f32.mrb[26].mxu0 }
 0xc6a   :  { %v1485_v49 = vmul.f32 %v1479_v32, %v3317_v0  ;;  %v1482_v15 = vadd.f32 %v1481_v47, %v1343_v3  ;;  %v2430_v11 = vpop.f32.mrb[27].mxu0  ;;  %v1665_v0 = vld [vmem:[%s3663_s18] sm:$0xff]  ;;  %v1668_v3 = vld [vmem:[%s3663_s18 + $0x18] sm:$0xff] }
 0xc6b   :  { %v2620_v4 = vpack.c.bf16 %v1668_v3, %v1667_v2  ;;  %v1909_v2 = vld [vmem:[%s3666_s21 + $0x68] sm:$0xff] }
 0xc6c   :  { %v1494_v52 = vadd.f32 %v2183_v46, %v1485_v49  ;;  %v1486_v53 = vmul.f32 %v1482_v15, %v3321_v1  ;;  %v2617_v1 = vpack.c.bf16 %v1666_v48, %v1665_v0  ;;  %v1801_v0 = vld [vmem:[%s3666_s21 + $0x8] sm:$0xff] }
 0xc6e   :  { %v1495_v60 = vadd.f32 %v2183_v46, %v1486_v53  ;;  %v1496_v54 = vmax.f32 %v1494_v52, 0.0 }
 0xc70   :  { %v1497_v55 = vmax.f32 %v1495_v60, 0.0 }
 0xc72   :  { %v1498_v61 = vpack.c.bf16 %v1497_v55, %v1496_v54 }
 0xc74   :  { %2432 = vmatpush3.bf16.msra.mxu1 %v1498_v61 }
 0xc75   :  { %2616 = vmatprep.subr.bf16.mxu1 %v2836_v35 }
 0xc77   :  { %2434 = vmatmul.mubr.msk.bf16.vlgmr.msra.gmra.mrb[20].mxu1 %vm475_vm13, %v164_v57  ;;  %vm1625_vm13 = vcmask 779264  }
 0xc78   :  { %2480 = vmatprep.mubr.msk.f32.mxu1 %vm2834_vm0, %v2833_v7  ;;  %2618 = vmatpush3.bf16.msra.mxu1 %v2617_v1  ;;  %v1626_v40 = vsel %vm1625_vm13, %v1624_v36, 0.0  ;;  %v1634_v13 = vsel %vm1625_vm13, %v1633_v39, 0.0  ;;  %v1908_v1 = vld [vmem:[%s3666_s21 + $0x60] sm:$0xff] }
 0xc79   :  { %2619 = vmatprep.subr.bf16.mxu1 %v2836_v35  ;;  %v1627_v43 = vrot.slane %v1626_v40, 4  ;;  %v1635_v32 = vrot.slane %v1634_v13, 4  ;;  %v2653_v3 = vpack.c.bf16 %v1909_v2, %v1908_v1 }
 0xc7b   :  { %v1628_v46 = vadd.f32 %v1627_v43, %v1626_v40  ;;  %v1636_v49 = vadd.f32 %v1635_v32, %v1634_v13  ;;  %v2186_v40 = vld [vmem:[%s3664_s19] ss:$0 sm:$0xff]  ;;  %s2838_s19 = smov [#allocation2]  }
 0xc7c   :  { %2621 = vmatpush3.bf16.msra.mxu1 %v2620_v4  ;;  %v1802_v4 = vld [vmem:[%s3666_s21 + $0x10] sm:$0xff] }
 0xc7d   :  { %2622 = vmatprep.subr.bf16.mxu1 %v2836_v35  ;;  %v1629_v11 = vrot.slane %v1628_v46, 2  ;;  %v1637_v52 = vrot.slane %v1636_v49, 2  ;;  %v2638_v50 = vpack.c.bf16 %v1803_v5, %v1802_v4 }
 0xc7f   :  { %v1630_v53 = vadd.f32 %v1629_v11, %v1628_v46  ;;  %v1638_v60 = vadd.f32 %v1637_v52, %v1636_v49  ;;  %v1759_v52 = vld [vmem:[%s3665_s20] sm:$0x3]  ;;  %s2120_s20 = sshll.u32 %s2838_s19, 4  ;;  %s2121_s20 = int_to_ptr.vmem [resolvable:$true] %s2120_s20 }
 0xc80   :  { %2624 = vmatpush3.bf16.msra.mxu1 %v2623_v12  ;;  %v1910_v12 = vld [vmem:[%s3666_s21 + $0x70] sm:$0xff] }
 0xc81   :  { %2625 = vmatprep.subr.bf16.mxu1 %v2836_v35  ;;  %v1631_v54 = vrot.slane %v1630_v53, 1  ;;  %v1639_v55 = vrot.slane %v1638_v60, 1  ;;  %v2656_v17 = vpack.c.bf16 %v1911_v16, %v1910_v12 }
 0xc83   :  { %v1632_v56 = vadd.f32 %v1631_v54, %v1630_v53  ;;  %v1640_v57 = vadd.f32 %v1639_v55, %v1638_v60  ;;  %v1760_v60 = vsel %vm176_vm2, %v1759_v52, 0.0 }
 0xc84   :  { %2627 = vmatpush3.bf16.msra.mxu1 %v2626_v18  ;;  %v1804_v18 = vld [vmem:[%s3666_s21 + $0x20] sm:$0xff] }
 0xc85   :  { %2628 = vmatprep.subr.bf16.mxu1 %v2836_v35  ;;  %v2641_v9 = vpack.c.bf16 %v1805_v19, %v1804_v18 }
 0xc88   :  { %2630 = vmatpush3.bf16.msra.mxu1 %v2629_v20  ;;  %v1912_v20 = vld [vmem:[%s3666_s21 + $0x80] sm:$0xff] }
 0xc89   :  { %2631 = vmatprep.subr.bf16.mxu1 %v2836_v35  ;;  %v2659_v21 = vpack.c.bf16 %v1913_v26, %v1912_v20 }
 0xc8c   :  { %2633 = vmatpush3.bf16.msra.mxu1 %v2632_v22  ;;  %v1806_v22 = vld [vmem:[%s3666_s21 + $0x30] sm:$0xff] }
 0xc8d   :  { %2652 = vmatprep.subr.bf16.mxu1 %v2836_v35 }
 0xd4a   :  { %v1536_v58 = vpop.f32.mrb[20].mxu1 }
 0xd4b   :  { %2454 = vmatmul.mubr.msk.f32.vlgmr.msra.gmra.mrb[2].mxu0 %vm1197_vm6, %v1536_v58  ;;  %v2435_v59 = vpop.f32.mrb[21].mxu1 }
 0xd4c   :  { %v1539_v62 = vpop.f32.mrb[22].mxu1  ;;  %2507 = vmatprep.mubr.msk.f32.mxu0 %vm2834_vm0, %v2833_v7 }
 0xd4d   :  { %v2436_v63 = vpop.f32.mrb[23].mxu1 }
 0xd4e   :  { %v1800_v63 = vld [vmem:[%s3666_s21] sm:$0xff] }
 0xd4f   :  { %v2635_v48 = vpack.c.bf16 %v1801_v0, %v1800_v63 }
 0xd51   :  { %2636 = vmatpush3.bf16.msra.mxu0 %v2635_v48 }
 0xd52   :  { %2637 = vmatprep.subr.bf16.mxu0 %v2836_v35 }
 0xd55   :  { %2639 = vmatpush3.bf16.msra.mxu0 %v2638_v50 }
 0xd56   :  { %2640 = vmatprep.subr.bf16.mxu0 %v2836_v35 }
 0xd59   :  { %2642 = vmatpush3.bf16.msra.mxu0 %v2641_v9 }
 0xd5a   :  { %2643 = vmatprep.subr.bf16.mxu0 %v2836_v35 }
 0xe1e   :  { %v1619_v25 = vpop.f32.mrb[2].mxu0 }
 0xe1f   :  { %v1641_v23 = vsel %vm1625_vm13, %v1619_v25, 0.0  ;;  %v2455_v24 = vpop.f32.mrb[3].mxu0 }
 0xe20   :  { %v1642_v27 = vrot.slane %v1641_v23, 4  ;;  %v1914_v24 = vld [vmem:[%s3666_s21 + $0x90] sm:$0xff] }
 0xe22   :  { %v1643_v28 = vadd.f32 %v1642_v27, %v1641_v23  ;;  %v1915_v27 = vld [vmem:[%s3666_s21 + $0x98] sm:$0xff] }
 0xe24   :  { %v1644_v29 = vrot.slane %v1643_v28, 2 }
 0xe26   :  { %v1645_v6 = vadd.f32 %v1644_v29, %v1643_v28  ;;  %v2662_v28 = vpack.c.bf16 %v1915_v27, %v1914_v24  ;;  %v1808_v29 = vld [vmem:[%s3666_s21 + $0x40] sm:$0xff] }
 0xe28   :  { %v1646_v10 = vrot.slane %v1645_v6, 1 }
 0xe2a   :  { %v1647_v30 = vadd.f32 %v1646_v10, %v1645_v6  ;;  %v1809_v6 = vld [vmem:[%s3666_s21 + $0x48] sm:$0xff] }
 0xe2b   :  { %v2647_v10 = vpack.c.bf16 %v1809_v6, %v1808_v29  ;;  %v2014_v29 = vld [vmem:[%s3666_s21 + $0xd8] sm:$0xff] }
 0xe2c   :  { %v1649_v31 = vmul.f32 0.5, %v1647_v30  ;;  %v1916_v30 = vld [vmem:[%s3666_s21 + $0xa0] sm:$0xff] }
 0xe2e   :  { %v1650_v33 = vsub.f32 %v1619_v25, %v1649_v31  ;;  %v1807_v25 = vld [vmem:[%s3666_s21 + $0x38] sm:$0xff]  ;;  %v1917_v31 = vld [vmem:[%s3666_s21 + $0xa8] sm:$0xff] }
 0xe2f   :  { %v2644_v23 = vpack.c.bf16 %v1807_v25, %v1806_v22  ;;  %v2011_v22 = vld [vmem:[%s3666_s21 + $0xc0] sm:$0xff]  ;;  %v2012_v25 = vld [vmem:[%s3666_s21 + $0xc8] sm:$0xff] }
 0xe30   :  { %v1651_v34 = vmul.f32 %v1650_v33, %v1650_v33  ;;  %v2671_v24 = vpack.c.bf16 %v2012_v25, %v2011_v22 }
 0xe31   :  { %2645 = vmatpush3.bf16.msra.mxu0 %v2644_v23 }
 0xe32   :  { %v1652_v37 = vsel %vm1625_vm13, %v1651_v34, 0.0  ;;  %2646 = vmatprep.subr.bf16.mxu0 %v2836_v35  ;;  %v1811_v34 = vld [vmem:[%s3666_s21 + $0x58] sm:$0xff] }
 0xe33   :  { %v1653_v38 = vrot.slane %v1652_v37, 4  ;;  %v2650_v36 = vpack.c.bf16 %v1811_v34, %v1810_v8  ;;  %v2019_v34 = vld [vmem:[%s3666_s21 + $0x100] sm:$0xff] }
 0xe35   :  { %v1654_v41 = vadd.f32 %v1653_v38, %v1652_v37  ;;  %2648 = vmatpush3.bf16.msra.mxu0 %v2647_v10  ;;  %v1918_v37 = vld [vmem:[%s3666_s21 + $0xb0] sm:$0xff]  ;;  %v1919_v38 = vld [vmem:[%s3666_s21 + $0xb8] sm:$0xff]  ;;  %v2015_v10 = vld [vmem:[%s3666_s21 + $0xe0] sm:$0xff] }
 0xe36   :  { %2649 = vmatprep.subr.bf16.mxu0 %v2836_v35  ;;  %v2668_v39 = vpack.c.bf16 %v1919_v38, %v1918_v37  ;;  %v2021_v38 = vld [vmem:[%s3666_s21 + $0x110] sm:$0xff] }
 0xe37   :  { %v1655_v42 = vrot.slane %v1654_v41, 2 }
 0xe39   :  { %v1656_v44 = vadd.f32 %v1655_v42, %v1654_v41  ;;  %2651 = vmatpush3.bf16.msra.mxu0 %v2650_v36  ;;  %v2020_v36 = vld [vmem:[%s3666_s21 + $0x108] sm:$0xff] }
 0xe3a   :  { %2670 = vmatprep.subr.bf16.mxu0 %v2836_v35  ;;  %v2683_v37 = vpack.c.bf16 %v2020_v36, %v2019_v34 }
 0xe3b   :  { %v1657_v45 = vrot.slane %v1656_v44, 1 }
 0xe3d   :  { %v1658_v47 = vadd.f32 %v1657_v45, %v1656_v44 }
 0xe3f   :  { %v1659_v15 = vmul.f32 0.5, %v1658_v47 }
 0xe41   :  { %v1660_v51 = vadd.f32 1e-05, %v1659_v15 }
 0xe43   :  { %2746 = vrsqrt.f32 %v1660_v51 }
 0xe4d   :  { %v2747_v61 = vpop.eup %2746 }
 0xe4e   :  { %v1662_v58 = vmul.f32 %v2747_v61, %v1650_v33  ;;  %v2665_v33 = vpack.c.bf16 %v1917_v31, %v1916_v30  ;;  %v1761_v61 = vsel %vm1625_vm13, %v1760_v60, 0.0  ;;  %v2016_v30 = vld [vmem:[%s3666_s21 + $0xe8] sm:$0xff] }
 0xe4f   :  { %v2677_v31 = vpack.c.bf16 %v2016_v30, %v2015_v10 }
 0xe50   :  { %v1663_v59 = vmul.f32 %v1662_v58, %v1632_v56  ;;  %v1768_v56 = vsel %vm186_vm3, %v1759_v52, 0.0 }
 0xe51   :  { %v1769_v58 = vsel %vm1625_vm13, %v1768_v56, 0.0 }
 0xe52   :  { %v1664_v62 = vadd.f32 %v1663_v59, %v1640_v57  ;;  %v1770_v0 = vrot.slane %v1769_v58, 4 }
 0xe54   :  { %2481 = vmatmul.mubr.msk.f32.vlgmr.msra.gmra.mrb[24].mxu1 %vm1684_vm15, %v1664_v62  ;;  %v1762_v62 = vrot.slane %v1761_v61, 4 }
 0xe55   :  { %2534 = vmatprep.mubr.msk.f32.mxu1 %vm2834_vm0, %v2833_v7  ;;  %2654 = vmatpush3.bf16.msra.mxu1 %v2653_v3  ;;  %v1771_v3 = vadd.f32 %v1770_v0, %v1769_v58 }
 0xe56   :  { %2655 = vmatprep.subr.bf16.mxu1 %v2836_v35  ;;  %v1763_v1 = vadd.f32 %v1762_v62, %v1761_v61 }
 0xe57   :  { %v1772_v12 = vrot.slane %v1771_v3, 2 }
 0xe58   :  { %v1764_v5 = vrot.slane %v1763_v1, 2 }
 0xe59   :  { %2657 = vmatpush3.bf16.msra.mxu1 %v2656_v17  ;;  %v1773_v17 = vadd.f32 %v1772_v12, %v1771_v3 }
 0xe5a   :  { %2658 = vmatprep.subr.bf16.mxu1 %v2836_v35  ;;  %v1765_v16 = vadd.f32 %v1764_v5, %v1763_v1 }
 0xe5b   :  { %v1774_v19 = vrot.slane %v1773_v17, 1 }
 0xe5c   :  { %v1766_v18 = vrot.slane %v1765_v16, 1 }
 0xe5d   :  { %2660 = vmatpush3.bf16.msra.mxu1 %v2659_v21  ;;  %v1775_v26 = vadd.f32 %v1774_v19, %v1773_v17 }
 0xe5e   :  { %2661 = vmatprep.subr.bf16.mxu1 %v2836_v35  ;;  %v1767_v9 = vadd.f32 %v1766_v18, %v1765_v16 }
 0xe61   :  { %2663 = vmatpush3.bf16.msra.mxu1 %v2662_v28  ;;  %v2013_v28 = vld [vmem:[%s3666_s21 + $0xd0] sm:$0xff] }
 0xe62   :  { %2664 = vmatprep.subr.bf16.mxu1 %v2836_v35  ;;  %v2674_v6 = vpack.c.bf16 %v2014_v29, %v2013_v28 }
 0xe65   :  { %2666 = vmatpush3.bf16.msra.mxu1 %v2665_v33  ;;  %v2017_v33 = vld [vmem:[%s3666_s21 + $0xf0] sm:$0xff] }
 0xe66   :  { %2667 = vmatprep.subr.bf16.mxu1 %v2836_v35 }
 0xe69   :  { %2669 = vmatpush3.bf16.msra.mxu1 %v2668_v39  ;;  %v2022_v39 = vld [vmem:[%s3666_s21 + $0x118] sm:$0xff] }
 0xf27   :  { %v1754_v41 = vpop.f32.mrb[24].mxu1 }
 0xf28   :  { %v1755_v13 = vadd.f32 %v2186_v40, %v1754_v41  ;;  %v2482_v42 = vpop.f32.mrb[25].mxu1  ;;  %v2686_v40 = vpack.c.bf16 %v2022_v39, %v2021_v38  ;;  %v1799_v41 = vld [vmem:[%s3667_s22] sm:$0x7] }
 0xf29   :  { %v1920_v42 = vsel %vm186_vm3, %v1799_v41, 0.0 }
 0xf2a   :  { %v1758_v43 = vmax.f32 %v1755_v13, 0.0  ;;  %v1812_v13 = vsel %vm176_vm2, %v1799_v41, 0.0  ;;  %vm1894_vm2 = vcmask 17408  }
 0xf2c   :  { %v1776_v44 = vsel %vm1625_vm13, %v1758_v43, 0.0 }
 0xf2d   :  { %v1777_v32 = vrot.slane %v1776_v44, 4 }
 0xf2f   :  { %v1778_v45 = vadd.f32 %v1777_v32, %v1776_v44 }
 0xf31   :  { %v1779_v46 = vrot.slane %v1778_v45, 2 }
 0xf33   :  { %v1780_v47 = vadd.f32 %v1779_v46, %v1778_v45 }
 0xf35   :  { %v1781_v49 = vrot.slane %v1780_v47, 1 }
 0xf37   :  { %v1782_v15 = vadd.f32 %v1781_v49, %v1780_v47 }
 0xf39   :  { %v1783_v11 = vmul.f32 0.5, %v1782_v15 }
 0xf3b   :  { %v1784_v51 = vsub.f32 %v1758_v43, %v1783_v11 }
 0xf3d   :  { %v1785_v53 = vmul.f32 %v1784_v51, %v1784_v51 }
 0xf3f   :  { %v1786_v54 = vsel %vm1625_vm13, %v1785_v53, 0.0  ;;  %v2023_v53 = vsel %vm335_vm5, %v1799_v41, 0.0 }
 0xf40   :  { %v1787_v55 = vrot.slane %v1786_v54, 4 }
 0xf42   :  { %v1788_v57 = vadd.f32 %v1787_v55, %v1786_v54 }
 0xf44   :  { %v1789_v59 = vrot.slane %v1788_v57, 2 }
 0xf46   :  { %v1790_v63 = vadd.f32 %v1789_v59, %v1788_v57 }
 0xf48   :  { %v1791_v48 = vrot.slane %v1790_v63, 1 }
 0xf4a   :  { %v1792_v2 = vadd.f32 %v1791_v48, %v1790_v63 }
 0xf4c   :  { %v1793_v4 = vmul.f32 0.5, %v1792_v2 }
 0xf4e   :  { %v1794_v50 = vadd.f32 1e-05, %v1793_v4 }
 0xf50   :  { %2748 = vrsqrt.f32 %v1794_v50 }
 0xf5a   :  { %v2749_v20 = vpop.eup %2748 }
 0xf5b   :  { %v1796_v21 = vmul.f32 %v2749_v20, %v1784_v51 }
 0xf5d   :  { %v1797_v23 = vmul.f32 %v1796_v21, %v1767_v9 }
 0xf5f   :  { %v1798_v27 = vadd.f32 %v1797_v23, %v1775_v26 }
 0xf61   :  { %2508 = vmatmul.mubr.msk.f32.vlgmr.msra.gmra.mrb[28].mxu0 %vm1684_vm15, %v1798_v27  ;;  %2535 = vmatmul.mubr.msk.f32.vlgmr.msra.gmra.mrb[26].mxu1 %vm1684_vm15, %v1798_v27 }
 0xf62   :  { %2672 = vmatpush3.bf16.msra.mxu0 %v2671_v24  ;;  %2561 = vmatprep.mubr.msk.f32.mxu0 %vm2834_vm0, %v2833_v7  ;;  %v2018_v7 = vld [vmem:[%s3666_s21 + $0xf8] sm:$0xff]  ;;  %vm1813_vm0 = vcmask 18432   ;;  %s2837_s21 = smov [#allocation4]  }
 0xf63   :  { %2673 = vmatprep.subr.bf16.mxu0 %v2836_v35  ;;  %v2680_v8 = vpack.c.bf16 %v2018_v7, %v2017_v33  ;;  %v1814_v43 = vsel %vm1813_vm0, %v1812_v13, 0.0  ;;  %v1921_v44 = vsel %vm1813_vm0, %v1920_v42, 0.0  ;;  %v2024_v55 = vsel %vm1813_vm0, %v2023_v53, 0.0  ;;  %s2130_s22 = sshll.u32 %s2837_s21, 4  ;;  %s2131_s22 = int_to_ptr.vmem [resolvable:$true] %s2130_s22 }
 0xf64   :  { %v1815_v32 = vrot.slane %v1814_v43, 4  ;;  %v2025_v63 = vrot.slane %v2024_v55, 4  ;;  %s2762_s10 = scalar_lea.vmem %s2131_s22, 32  ;;  %p2767_p1 = scmp.lt.s32.totalorder %s2131_s22, %s2131_s22 }
 0xf65   :  { %p2763_p0 = scmp.ne.s32.totalorder %s2131_s22, %s2762_s10  ;;  %p2768_p2 = scmp.lt.s32.totalorder %s2762_s10, %s2762_s10 }
 0xf66   :  { %2675 = vmatpush3.bf16.msra.mxu0 %v2674_v6  ;;  %v1816_v45 = vadd.f32 %v1815_v32, %v1814_v43  ;;  %v2026_v14 = vadd.f32 %v2025_v63, %v2024_v55 }
 0xf67   :  { %2676 = vmatprep.subr.bf16.mxu0 %v2836_v35  ;;  %p2769_p3 = por %p2768_p2, %p2767_p1 }
 0xf68   :  { %v1817_v47 = vrot.slane %v1816_v45, 2  ;;  %v2027_v1 = vrot.slane %v2026_v14, 2 }
 0xf69   :  { %p2770_p4 = pnand %p2769_p3, %p2763_p0 }
 0xf6a   :  { %2678 = vmatpush3.bf16.msra.mxu0 %v2677_v31  ;;  %v1818_v15 = vadd.f32 %v1817_v47, %v1816_v45  ;;  %v2028_v2 = vadd.f32 %v2027_v1, %v2026_v14 }
 0xf6b   :  { %2679 = vmatprep.subr.bf16.mxu0 %v2836_v35 }
 0xf6c   :  { %v1819_v51 = vrot.slane %v1818_v15, 1  ;;  %v2029_v3 = vrot.slane %v2028_v2, 1 }
 0xf6e   :  { %2681 = vmatpush3.bf16.msra.mxu0 %v2680_v8  ;;  %v1820_v60 = vadd.f32 %v1819_v51, %v1818_v15  ;;  %v2030_v4 = vadd.f32 %v2029_v3, %v2028_v2 }
 0xf6f   :  { %2682 = vmatprep.subr.bf16.mxu0 %v2836_v35 }
 0xf72   :  { %2684 = vmatpush3.bf16.msra.mxu0 %v2683_v37 }
 0xf73   :  { %2685 = vmatprep.subr.bf16.mxu0 %v2836_v35  ;;  %v1922_v35 = vrot.slane %v1921_v44, 4 }
 0xf75   :  { %v1923_v46 = vadd.f32 %v1922_v35, %v1921_v44 }
 0xf76   :  { %2687 = vmatpush3.bf16.msra.mxu0 %v2686_v40 }
 0xf77   :  { %v1924_v49 = vrot.slane %v1923_v46, 2 }
 0xf79   :  { %2562 = vmatmul.mubr.msk.f32.vlgmr.msra.gmra.mrb[30].mxu0 %vm1684_vm15, %v1798_v27  ;;  %v1925_v11 = vadd.f32 %v1924_v49, %v1923_v46 }
 0xf7b   :  { %v1926_v52 = vrot.slane %v1925_v11, 1 }
 0xf7d   :  { %v1927_v54 = vadd.f32 %v1926_v52, %v1925_v11 }
0x1034   :  { %v1890_v56 = vpop.f32.mrb[28].mxu0  ;;  %v1994_v61 = vpop.f32.mrb[26].mxu1 }
0x1035   :  { %v1891_v57 = vadd.f32 %v1890_v56, %v1820_v60  ;;  %v1995_v58 = vadd.f32 %v1994_v61, %v1927_v54  ;;  %v2509_v59 = vpop.f32.mrb[29].mxu0  ;;  %v2536_v62 = vpop.f32.mrb[27].mxu1 }
0x1037   :  { %v1998_v0 = vsel %vm1894_vm2, %v1995_v58, -inf  ;;  %v1895_v48 = vsel %vm1894_vm2, %v1891_v57, -inf }
0x1038   :  { %1999 = vmax.xlane.f32.xlu0 %v1998_v0  ;;  %1896 = vmax.xlane.f32.xlu1 %v1895_v48 }
0x104c   :  { %v2097_v5 = vpop.f32.mrb[30].mxu0 }
0x104d   :  { %v2098_v50 = vadd.f32 %v2097_v5, %v2030_v4  ;;  %v2563_v12 = vpop.f32.mrb[31].mxu0 }
0x104f   :  { %v2101_v16 = vsel %vm1894_vm2, %v2098_v50, -inf }
0x1050   :  { %2102 = vmax.xlane.f32.xlu0 %v2101_v16 }
0x10c5   :  { %v2000_v17 = vpop.xlane.xlu0 %1999  ;;  %v1897_v18 = vpop.xlane.xlu1 %1896 }
0x10c6   :  { %v2001_v19 = vsub.f32 %v1995_v58, %v2000_v17  ;;  %v1898_v9 = vsub.f32 %v1891_v57, %v1897_v18 }
0x10c8   :  { %v2002_v20 = vmul.f32 1.442695, %v2001_v19  ;;  %v1899_v26 = vmul.f32 1.442695, %v1898_v9 }
0x10ca   :  { %2750 = vpow2.f32 %v2002_v20 }
0x10cb   :  { %2752 = vpow2.f32 %v1899_v26 }
0x10d4   :  { %v2751_v21 = vpop.eup %2750 }
0x10d5   :  { %v2753_v22 = vpop.eup %2752  ;;  %v2004_v25 = vsel %vm1894_vm2, %v2751_v21, 0.0 }
0x10d6   :  { %v1901_v23 = vsel %vm1894_vm2, %v2753_v22, 0.0  ;;  %2005 = vadd.xlane.f32.xlu0 %v2004_v25 }
0x10d7   :  { %1902 = vadd.xlane.f32.xlu1 %v1901_v23 }
0x10dd   :  { %v2103_v24 = vpop.xlane.xlu0 %2102 }
0x10de   :  { %v2104_v27 = vsub.f32 %v2098_v50, %v2103_v24 }
0x10e0   :  { %v2105_v28 = vmul.f32 1.442695, %v2104_v27 }
0x10e2   :  { %2754 = vpow2.f32 %v2105_v28 }
0x10ec   :  { %v2755_v29 = vpop.eup %2754 }
0x10ed   :  { %v2107_v6 = vsel %vm1894_vm2, %v2755_v29, 0.0 }
0x10ee   :  { %2108 = vadd.xlane.f32.xlu0 %v2107_v6 }
0x1163   :  { %v2006_v10 = vpop.xlane.xlu0 %2005 }
0x1164   :  { %v1903_v30 = vpop.xlane.xlu1 %1902  ;;  %2756 = vlog2.f32 %v2006_v10 }
0x1165   :  { %2758 = vlog2.f32 %v1903_v30 }
0x116e   :  { %v2757_v31 = vpop.eup %2756 }
0x116f   :  { %v2759_v33 = vpop.eup %2758  ;;  %v2008_v7 = vmul.f32 0.6931472, %v2757_v31 }
0x1170   :  { %v1905_v8 = vmul.f32 0.6931472, %v2759_v33 }
0x1171   :  { %v2009_v34 = vsub.f32 %v2001_v19, %v2008_v7 }
0x1172   :  { %v1906_v36 = vsub.f32 %v1898_v9, %v1905_v8 }
0x1173   :  { %2010 = vst.msk [vmem:[#allocation4] sm:$0x3] %vm1894_vm2, %v2009_v34 }
0x1174   :  { %2773 = shalt.err (!%p2770_p4)
}
0x1175   :  { %s2774_s4 = scalar_lea.hbm %s3669_s24, 32 }
0x1176   :  { %p2775_p5 = scmp.ne.s32.totalorder %s3669_s24, %s2774_s4  ;;  %p2778_p6 = scmp.lt.u32.totalorder %s2774_s4, %s3669_s24 }
0x1178   :  { %p2780_p7 = pnand %p2778_p6, %p2775_p5 }
0x117a   :  { %2783 = shalt.err (!%p2780_p7)
}
0x117b   :  { %2133 = dma.vmem_to_hbm [thread:$0]  %s2131_s22, 32, %s3669_s24, [#allocation5]   ;;  %1907 = vst.msk [vmem:[#allocation2] sm:$0x3] %vm1894_vm2, %v1906_v36 }
0x117c   :  { %s2784_s2 = scalar_lea.vmem %s2121_s20, 32  ;;  %p2789_p9 = scmp.lt.s32.totalorder %s2121_s20, %s2121_s20 }
0x117d   :  { %p2785_p8 = scmp.ne.s32.totalorder %s2121_s20, %s2784_s2  ;;  %p2790_p10 = scmp.lt.s32.totalorder %s2784_s2, %s2784_s2 }
0x117f   :  { %p2791_p11 = por %p2790_p10, %p2789_p9 }
0x1181   :  { %p2792_p12 = pnand %p2791_p11, %p2785_p8 }
0x1183   :  { %2795 = shalt.err (!%p2792_p12)
}
0x1184   :  { %s2796_s16 = scalar_lea.hbm %s3668_s23, 32 }
0x1185   :  { %p2797_p13 = scmp.ne.s32.totalorder %s3668_s23, %s2796_s16  ;;  %p2800_p0 = scmp.lt.u32.totalorder %s2796_s16, %s3668_s23 }
0x1187   :  { %p2802_p1 = pnand %p2800_p0, %p2797_p13 }
0x1189   :  { %2805 = shalt.err (!%p2802_p1)
}
0x118a   :  { %2123 = dma.vmem_to_hbm [thread:$0]  %s2121_s20, 32, %s3668_s23, [#allocation3]   ;;  %v2109_v37 = vpop.xlane.xlu0 %2108 }
0x118b   :  { %2760 = vlog2.f32 %v2109_v37  ;;  %s2839_s26 = smov [#allocation6]  }
0x118c   :  { %s2140_s17 = sshll.u32 %s2839_s26, 4  ;;  %s2141_s17 = int_to_ptr.vmem [resolvable:$true] %s2140_s17 }
0x118d   :  { %s2806_s18 = scalar_lea.vmem %s2141_s17, 32  ;;  %p2811_p3 = scmp.lt.s32.totalorder %s2141_s17, %s2141_s17 }
0x118e   :  { %p2807_p2 = scmp.ne.s32.totalorder %s2141_s17, %s2806_s18  ;;  %p2812_p4 = scmp.lt.s32.totalorder %s2806_s18, %s2806_s18 }
0x1190   :  { %p2813_p5 = por %p2812_p4, %p2811_p3 }
0x1192   :  { %p2814_p6 = pnand %p2813_p5, %p2807_p2 }
0x1195   :  { %v2761_v38 = vpop.eup %2760 }
0x1196   :  { %v2111_v39 = vmul.f32 0.6931472, %v2761_v38 }
0x1198   :  { %v2112_v40 = vsub.f32 %v2104_v27, %v2111_v39 }
0x119a   :  { %2113 = vst.msk [vmem:[#allocation6] sm:$0x3] %vm1894_vm2, %v2112_v40 }
0x119b   :  { %2817 = shalt.err (!%p2814_p6)
}
0x119c   :  { %s2818_s23 = scalar_lea.hbm %s3670_s25, 32 }
0x119d   :  { %p2819_p7 = scmp.ne.s32.totalorder %s3670_s25, %s2818_s23  ;;  %p2822_p8 = scmp.lt.u32.totalorder %s2818_s23, %s3670_s25 }
0x119f   :  { %p2824_p9 = pnand %p2822_p8, %p2819_p7 }
0x11a1   :  { %2827 = shalt.err (!%p2824_p9)
}
0x11a2   :  { %2143 = dma.vmem_to_hbm [thread:$0]  %s2141_s17, 32, %s3670_s25, [#allocation5]  }
0x11a3   :  { %2828 = dma.done.wait [#allocation3], 32  }
0x11a4   :  { %2829 = vsyncadd [#allocation3], 4294967264 }
0x11a5   :  { %2830 = dma.done.wait [#allocation5], 64  }
0x11a6   :  { %2831 = vsyncadd [#allocation5], 4294967232 }
0x11a7   :  { %2153 = vsyncpa [#allocation3], 1 }
0x11a8   :  { %2154 = vsyncpa [#allocation5], 1 }

</bundles_post_ra>
